<compile_context>
chip_gen: v7x
topology: tpu7x:2x2x1
jax: 0.10.0
libtpu: 0.0.40
codegen_flags: <defaults>
</compile_context>

<pallas_src>
import itertools
import numpy as np
import jax
import jax.numpy as jnp
from jax.experimental import pallas as pl
from jax.experimental.pallas import tpu as pltpu


# --------------------------------------------------------------------------
# Deterministic synthetic limb convention (replaces mmhuman3d search_limbs):
# a simple 16-keypoint body skeleton, sorted + de-duplicated like the module.
# --------------------------------------------------------------------------
_RAW_LIMBS = [
    [0, 1], [1, 2], [2, 3], [3, 4],
    [1, 5], [5, 6], [6, 7],
    [0, 8], [8, 9], [9, 10], [10, 11],
    [8, 12], [12, 13], [13, 14], [14, 15],
    [0, 1],  # duplicate, removed by groupby like in the torch module
]
_LIMBS_SORTED = sorted([tuple(x) for x in _RAW_LIMBS])
LIMB_IDXS = np.array([x for x, _ in itertools.groupby(_LIMBS_SORTED)], dtype=np.int32)
NUM_KPTS = 16


def _round_up(x, m):
    return ((x + m - 1) // m) * m


def _build_rhs(limb_idxs, kp_pad, lp_pad):
    """Compile-time constant RHS: [ D | S_src | S_dst ], shape (kp_pad, 3*lp_pad).

    D[:, l]     : +1 at dst(l), -1 at src(l)   ->  limb_vec  = kp   @ D
    S_src[:, l] : one-hot at src(l)            ->  conf_src  = conf @ S_src
    S_dst[:, l] : one-hot at dst(l)            ->  conf_dst  = conf @ S_dst
    Padded limb columns / padded keypoint rows stay all-zero, so padded limbs
    pick up exactly-zero confidence and contribute nothing to the loss.
    """
    rhs = np.zeros((kp_pad, 3 * lp_pad), np.float32)
    for l, (s, d) in enumerate(np.asarray(limb_idxs)):
        rhs[d, l] += 1.0
        rhs[s, l] -= 1.0
        rhs[s, lp_pad + l] = 1.0
        rhs[d, 2 * lp_pad + l] = 1.0
    return jnp.asarray(rhs)


def _make_kernel(n_pad, lp_pad, eps, conf_threshold, scale):
    def kernel(data_ref, rhs_ref, out_ref):
        # One fused MXU matmul performs (a) the per-limb keypoint gather and
        # dst-src difference and (b) the per-limb confidence gather.
        #   data: (8*n_pad, Kp) rows = [pred_x|pred_y|pred_z|tgt_x|tgt_y|tgt_z|
        #                               pred_conf|tgt_conf] blocks of n_pad rows
        #   rhs : (Kp, 3*lp_pad) cols = [ D | S_src | S_dst ]
        r = jnp.dot(data_ref[...], rhs_ref[...],
                    precision=jax.lax.Precision.HIGHEST,
                    preferred_element_type=jnp.float32)

        def kp_blk(t, c):  # limb-vector component c (0..2) of tensor t (0=pred,1=tgt)
            row = (t * 3 + c) * n_pad
            return r[row:row + n_pad, 0:lp_pad]

        px, py, pz = kp_blk(0, 0), kp_blk(0, 1), kp_blk(0, 2)
        tx, ty, tz = kp_blk(1, 0), kp_blk(1, 1), kp_blk(1, 2)

        # xyz reduction as plain VALU multiply-adds (components are separate
        # 8-aligned sublane blocks -> no cross-sublane XLU reduce).
        dot_pt = px * tx + py * ty + pz * tz
        len_p = jnp.sqrt(px * px + py * py + pz * pz)
        len_t = jnp.sqrt(tx * tx + ty * ty + tz * tz)

        # Folded normalization: one EUP reciprocal instead of two broadcast
        # divides over (N, 3, Lp); unit vectors never materialized.
        cosine = dot_pt * pl.reciprocal((len_p + eps) * (len_t + eps),
                                        approx=True)

        def conf_blk(t, sel):  # sel: 0 = src gather, 1 = dst gather
            row = (6 + t) * n_pad
            col = (1 + sel) * lp_pad
            return r[row:row + n_pad, col:col + lp_pad]

        def thr(c):  # (c > T) * c ; one-hot selection commutes with thr
            return jnp.where(c > conf_threshold, c, jnp.zeros_like(c))

        conf_p = jnp.minimum(thr(conf_blk(0, 1)), thr(conf_blk(0, 0)))
        conf_t = jnp.minimum(thr(conf_blk(1, 1)), thr(conf_blk(1, 0)))

        # Padded limbs / padded batch rows have conf == 0 exactly -> no mask.
        loss = (cosine - 1.0) ** 2 * (conf_t * conf_p)
        out_ref[0, 0] = jnp.sum(loss) * scale

    return kernel


def limb_direction_loss(pred, target, pred_conf=None, target_conf=None, *,
                        limb_idxs=LIMB_IDXS, eps=1e-6, conf_threshold=1.0,
                        loss_weight=1.0, reduction='mean'):
    """Pallas implementation of LimbDirectionLoss.forward.

    pred, target: (N, K, 3) float32.
    pred_conf, target_conf: (N, K) float32 (the module's default-None path
    uses ones of shape (N, K)). Returns a scalar (mean/sum reductions).
    """
    assert reduction in ('mean', 'sum')
    # TODO(synk): reduction='none' (per-limb loss output) not implemented.
    pred = pred.astype(jnp.float32)
    target = target.astype(jnp.float32)
    n, k, dim = pred.shape
    assert dim == 3 and target.shape == pred.shape

    if pred_conf is None:
        pred_conf = jnp.ones((n, k), jnp.float32)
    if target_conf is None:
        target_conf = jnp.ones((n, k), jnp.float32)
    if pred_conf.ndim == 3:
        pred_conf = pred_conf[..., 0]
    if target_conf.ndim == 3:
        target_conf = target_conf[..., 0]
    pred_conf = pred_conf.astype(jnp.float32)
    target_conf = target_conf.astype(jnp.float32)

    num_limbs = int(limb_idxs.shape[0])
    n_pad = _round_up(n, 8)           # batch rows per sublane block (8-aligned)
    kp_pad = _round_up(k, 128)        # keypoints on lanes (matmul contraction)
    lp_pad = _round_up(num_limbs, 128)  # limbs on lanes of the result

    # Single packed data operand (one DMA): (8*n_pad, kp_pad)
    #   rows [0 : 6*n_pad)       : [pred|target] x [x|y|z] keypoint components
    #   rows [6*n_pad : 8*n_pad) : [pred|target] keypoint confidences
    kp = jnp.stack([pred, target], axis=0)             # (2, n, k, 3)
    kp = jnp.transpose(kp, (0, 3, 1, 2))               # (2, 3, n, k)
    kp = jnp.pad(kp, ((0, 0), (0, 0), (0, n_pad - n), (0, kp_pad - k)))
    kp = kp.reshape(6 * n_pad, kp_pad)

    cf = jnp.stack([pred_conf, target_conf], axis=0)   # (2, n, k)
    cf = jnp.pad(cf, ((0, 0), (0, n_pad - n), (0, kp_pad - k)))
    cf = cf.reshape(2 * n_pad, kp_pad)

    data = jnp.concatenate([kp, cf], axis=0)           # (8*n_pad, kp_pad)

    rhs = _build_rhs(limb_idxs, kp_pad, lp_pad)        # (kp_pad, 3*lp_pad) const

    if reduction == 'mean':
        scale = float(loss_weight) / float(n * num_limbs)
    else:  # 'sum'
        scale = float(loss_weight)

    kernel = _make_kernel(n_pad, lp_pad, float(eps), float(conf_threshold),
                          scale)

    # Single block, no grid: the whole problem fits in a handful of vregs.
    # TODO(synk): for very large batches, tile the batch-block axis with a
    # parallel grid (dimension_semantics=("parallel",)) and a pl.when-finalized
    # SMEM accumulator so both v7x TensorCores are used; size blocks against
    # v7x's 32 MiB scoped VMEM (v5e/v6e have ~2x more headroom).
    out = pl.pallas_call(
        kernel,
        out_shape=jax.ShapeDtypeStruct((1, 1), jnp.float32),
        in_specs=[pl.BlockSpec(memory_space=pltpu.MemorySpace.VMEM)] * 2,
        out_specs=pl.BlockSpec(memory_space=pltpu.MemorySpace.SMEM),
    )(data, rhs)
    return out[0, 0]


# --------------------------------------------------------------------------
# Pure-JAX reference (mirrors the torch forward, (N, K) confidence path).
# --------------------------------------------------------------------------
def reference_limb_direction_loss(pred, target, pred_conf, target_conf, *,
                                  limb_idxs=LIMB_IDXS, eps=1e-6,
                                  conf_threshold=1.0, loss_weight=1.0,
                                  reduction='mean'):
    src, dst = limb_idxs[:, 0], limb_idxs[:, 1]

    def unit_vec(kp):
        v = kp[:, dst, :] - kp[:, src, :]
        l = jnp.linalg.norm(v, axis=2)
        return v / (l[..., None] + eps)

    def limb_conf(c):
        c = (c > conf_threshold) * c
        return jnp.minimum(c[:, dst], c[:, src])

    up, ut = unit_vec(pred), unit_vec(target)
    conf = limb_conf(target_conf) * limb_conf(pred_conf)
    cosine = jnp.sum(ut * up, axis=-1)
    loss = (cosine - 1.0) ** 2 * conf
    loss = loss.mean() if reduction == 'mean' else loss.sum()
    return loss * loss_weight


if __name__ == "__main__":
    key = jax.random.PRNGKey(0)
    k1, k2, k3, k4 = jax.random.split(key, 4)

    N, K = 2, NUM_KPTS
    pred = jax.random.normal(k1, (N, K, 3), jnp.float32)
    target = jax.random.normal(k2, (N, K, 3), jnp.float32)
    # confidences in [0, 2) so the conf_threshold actually gates some limbs
    pred_conf = jax.random.uniform(k3, (N, K), jnp.float32, 0.0, 2.0)
    target_conf = jax.random.uniform(k4, (N, K), jnp.float32, 0.0, 2.0)

    eps, thr, lw = 1e-6, 1.0, 1.0

    ok = True
    for reduction in ('mean', 'sum'):
        out = limb_direction_loss(pred, target, pred_conf, target_conf,
                                  eps=eps, conf_threshold=thr, loss_weight=lw,
                                  reduction=reduction)
        out = jax.block_until_ready(out)
        ref = reference_limb_direction_loss(pred, target, pred_conf,
                                            target_conf, eps=eps,
                                            conf_threshold=thr, loss_weight=lw,
                                            reduction=reduction)
        ref = jax.block_until_ready(ref)
        # Tolerance is slightly relaxed (vs. 1e-5) because the kernel uses the
        # EUP approximate reciprocal for the folded cosine normalization.
        ok = ok and bool(jnp.allclose(out, ref, rtol=5e-3, atol=1e-4))
        assert ok, (reduction, out, ref)

    print("KERNEL_OK")
</pallas_src>

<mosaic_0001>
module attributes {stable_mosaic.version = 11 : i64} {
  func.func @kernel(%arg0: memref<64x128xf32, #tpu.memory_space<vmem>>, %arg1: memref<128x384xf32, #tpu.memory_space<vmem>>, %arg2: memref<1x1xf32, #tpu.memory_space<smem>>) attributes {dimension_semantics = [], scalar_prefetch = 0 : i64, scratch_operands = 0 : i64, tpu.core_type = #tpu.core_type<tc>} {
    %c0 = arith.constant 0 : index
    %c0_0 = arith.constant 0 : index
    %0 = vector.load %arg0[%c0, %c0_0] : memref<64x128xf32, #tpu.memory_space<vmem>>, vector<64x128xf32>
    %c0_1 = arith.constant 0 : index
    %c0_2 = arith.constant 0 : index
    %1 = vector.load %arg1[%c0_1, %c0_2] : memref<128x384xf32, #tpu.memory_space<vmem>>, vector<128x384xf32>
    %cst = arith.constant dense<0.000000e+00> : vector<64x384xf32>
    %2 = tpu.matmul %0, %1, %cst {dimension_numbers = #tpu.dot_dimension_numbers<[1], [0], [0], [1], [0, 0, 1, 1], [], []>, precision = #tpu.contract_precision<fp32>} : vector<64x128xf32>, vector<128x384xf32>, vector<64x384xf32> -> vector<64x384xf32>
    %3 = vector.extract_strided_slice %2 {offsets = [0, 0], sizes = [8, 128], strides = [1, 1]} : vector<64x384xf32> to vector<8x128xf32>
    %4 = vector.extract_strided_slice %2 {offsets = [8, 0], sizes = [8, 128], strides = [1, 1]} : vector<64x384xf32> to vector<8x128xf32>
    %5 = vector.extract_strided_slice %2 {offsets = [16, 0], sizes = [8, 128], strides = [1, 1]} : vector<64x384xf32> to vector<8x128xf32>
    %6 = vector.extract_strided_slice %2 {offsets = [24, 0], sizes = [8, 128], strides = [1, 1]} : vector<64x384xf32> to vector<8x128xf32>
    %7 = vector.extract_strided_slice %2 {offsets = [32, 0], sizes = [8, 128], strides = [1, 1]} : vector<64x384xf32> to vector<8x128xf32>
    %8 = vector.extract_strided_slice %2 {offsets = [40, 0], sizes = [8, 128], strides = [1, 1]} : vector<64x384xf32> to vector<8x128xf32>
    %9 = arith.mulf %3, %6 : vector<8x128xf32>
    %10 = arith.mulf %4, %7 : vector<8x128xf32>
    %11 = arith.addf %9, %10 : vector<8x128xf32>
    %12 = arith.mulf %5, %8 : vector<8x128xf32>
    %13 = arith.addf %11, %12 : vector<8x128xf32>
    %14 = arith.mulf %3, %3 : vector<8x128xf32>
    %15 = arith.mulf %4, %4 : vector<8x128xf32>
    %16 = arith.addf %14, %15 : vector<8x128xf32>
    %17 = arith.mulf %5, %5 : vector<8x128xf32>
    %18 = arith.addf %16, %17 : vector<8x128xf32>
    %19 = math.sqrt %18 : vector<8x128xf32>
    %20 = arith.mulf %6, %6 : vector<8x128xf32>
    %21 = arith.mulf %7, %7 : vector<8x128xf32>
    %22 = arith.addf %20, %21 : vector<8x128xf32>
    %23 = arith.mulf %8, %8 : vector<8x128xf32>
    %24 = arith.addf %22, %23 : vector<8x128xf32>
    %25 = math.sqrt %24 : vector<8x128xf32>
    %cst_3 = arith.constant 9.99999997E-7 : f32
    %26 = vector.broadcast %cst_3 : f32 to vector<8x128xf32>
    %27 = arith.addf %19, %26 : vector<8x128xf32>
    %cst_4 = arith.constant 9.99999997E-7 : f32
    %28 = vector.broadcast %cst_4 : f32 to vector<8x128xf32>
    %29 = arith.addf %25, %28 : vector<8x128xf32>
    %30 = arith.mulf %27, %29 : vector<8x128xf32>
    %31 = tpu.reciprocal %30 {approx = true} : vector<8x128xf32> -> vector<8x128xf32>
    %32 = arith.mulf %13, %31 : vector<8x128xf32>
    %33 = vector.extract_strided_slice %2 {offsets = [48, 256], sizes = [8, 128], strides = [1, 1]} : vector<64x384xf32> to vector<8x128xf32>
    %cst_5 = arith.constant 1.000000e+00 : f32
    %34 = vector.broadcast %cst_5 : f32 to vector<8x128xf32>
    %35 = arith.cmpf ogt, %33, %34 : vector<8x128xf32>
    %cst_6 = arith.constant 0.000000e+00 : f32
    %36 = vector.broadcast %cst_6 : f32 to vector<8x128xf32>
    %37 = arith.select %35, %33, %36 : vector<8x128xi1>, vector<8x128xf32>
    %38 = vector.extract_strided_slice %2 {offsets = [48, 128], sizes = [8, 128], strides = [1, 1]} : vector<64x384xf32> to vector<8x128xf32>
    %cst_7 = arith.constant 1.000000e+00 : f32
    %39 = vector.broadcast %cst_7 : f32 to vector<8x128xf32>
    %40 = arith.cmpf ogt, %38, %39 : vector<8x128xf32>
    %cst_8 = arith.constant 0.000000e+00 : f32
    %41 = vector.broadcast %cst_8 : f32 to vector<8x128xf32>
    %42 = arith.select %40, %38, %41 : vector<8x128xi1>, vector<8x128xf32>
    %43 = arith.minimumf %37, %42 : vector<8x128xf32>
    %44 = vector.extract_strided_slice %2 {offsets = [56, 256], sizes = [8, 128], strides = [1, 1]} : vector<64x384xf32> to vector<8x128xf32>
    %cst_9 = arith.constant 1.000000e+00 : f32
    %45 = vector.broadcast %cst_9 : f32 to vector<8x128xf32>
    %46 = arith.cmpf ogt, %44, %45 : vector<8x128xf32>
    %cst_10 = arith.constant 0.000000e+00 : f32
    %47 = vector.broadcast %cst_10 : f32 to vector<8x128xf32>
    %48 = arith.select %46, %44, %47 : vector<8x128xi1>, vector<8x128xf32>
    %49 = vector.extract_strided_slice %2 {offsets = [56, 128], sizes = [8, 128], strides = [1, 1]} : vector<64x384xf32> to vector<8x128xf32>
    %cst_11 = arith.constant 1.000000e+00 : f32
    %50 = vector.broadcast %cst_11 : f32 to vector<8x128xf32>
    %51 = arith.cmpf ogt, %49, %50 : vector<8x128xf32>
    %cst_12 = arith.constant 0.000000e+00 : f32
    %52 = vector.broadcast %cst_12 : f32 to vector<8x128xf32>
    %53 = arith.select %51, %49, %52 : vector<8x128xi1>, vector<8x128xf32>
    %54 = arith.minimumf %48, %53 : vector<8x128xf32>
    %cst_13 = arith.constant 1.000000e+00 : f32
    %55 = vector.broadcast %cst_13 : f32 to vector<8x128xf32>
    %56 = arith.subf %32, %55 : vector<8x128xf32>
    %57 = arith.mulf %56, %56 : vector<8x128xf32>
    %58 = arith.mulf %54, %43 : vector<8x128xf32>
    %59 = arith.mulf %57, %58 : vector<8x128xf32>
    %60 = vector.shape_cast %59 : vector<8x128xf32> to vector<1x8x128xf32>
    %cst_14 = arith.constant dense<0.000000e+00> : vector<1xf32>
    %61 = vector.multi_reduction <add>, %60, %cst_14 [1, 2] : vector<1x8x128xf32> to vector<1xf32>
    %62 = vector.shape_cast %61 : vector<1xf32> to vector<1x1x1xf32>
    %63 = vector.extract %62[0, 0, 0] : f32 from vector<1x1x1xf32>
    %cst_15 = arith.constant 0.0333333351 : f32
    %64 = arith.mulf %63, %cst_15 : f32
    %c0_16 = arith.constant 0 : index
    %c0_17 = arith.constant 0 : index
    %65 = memref.load %arg2[%c0_16, %c0_17] : memref<1x1xf32, #tpu.memory_space<smem>>
    memref.store %64, %arg2[%c0_16, %c0_17] : memref<1x1xf32, #tpu.memory_space<smem>>
    return
  }
}

</mosaic_0001>

<bundles_post_ra>
// kernel: tpu_custom_call.1
= control target key start
LH: loop header
LB: loop body
LE: loop exit
PB: predicated region body
PF: predicated region fallthrough
CT: control target
= control target key end

     0   :  { %7 = vsyncpa [#allocation3], 0  ;;  %s4237_s0 = inlined_call_operand.hbm [shape: f32[64,128], index: 0, kind: input, shape index: {}]   ;;  %s4238_s1 = inlined_call_operand.hbm [shape: f32[128,384], index: 1, kind: input, shape index: {}]   ;;  %s4239_s2 = inlined_call_operand.hbm [shape: f32[1,1], index: 2, kind: output, shape index: {}]  }
   0x1   :  { %8 = vsyncpa [#allocation6], 0 }
   0x2   :  { %9 = vsyncpa [#allocation4], 0  ;;  %s3186_s9 = smov [#allocation2]   ;;  %s3126_s13 = scalar_lea.hbm %s4237_s0, 1024 }
   0x3   :  { %s15_s10 = sshll.u32 %s3186_s9, 4  ;;  %p3127_p0 = scmp.ne.s32.totalorder %s4237_s0, %s3126_s13  ;;  %s16_s10 = int_to_ptr.vmem [resolvable:$true] %s15_s10 }
   0x4   :  { %p3130_p1 = scmp.lt.u32.totalorder %s3126_s13, %s4237_s0 }
   0x6   :  { %p3132_p2 = pnand %p3130_p1, %p3127_p0 }
   0x8   :  { %3135 = shalt.err (!%p3132_p2)
}
   0x9   :  { %s3136_s18 = scalar_lea.vmem %s16_s10, 1024  ;;  %p3141_p4 = scmp.lt.s32.totalorder %s16_s10, %s16_s10 }
   0xa   :  { %p3137_p3 = scmp.ne.s32.totalorder %s16_s10, %s3136_s18  ;;  %p3142_p5 = scmp.lt.s32.totalorder %s3136_s18, %s3136_s18 }
   0xc   :  { %p3143_p6 = por %p3142_p5, %p3141_p4 }
   0xe   :  { %p3144_p7 = pnand %p3143_p6, %p3137_p3 }
  0x10   :  { %3147 = shalt.err (!%p3144_p7)
}
  0x11   :  { %s3187_s19 = smov 128   ;;  %s3188_s20 = smov 8  }
  0x12   :  { %21 = dma.hbm_to_vmem [thread:$0]  %s4237_s0, 1024, %s16_s10, [#allocation3], %s3187_s19, %s3187_s19, %s3188_s20  }
  0x13   :  { %s3189_s23 = smov [#allocation5]   ;;  %s3148_s27 = scalar_lea.hbm %s4238_s1, 6144 }
  0x14   :  { %s27_s24 = sshll.u32 %s3189_s23, 4  ;;  %p3149_p8 = scmp.ne.s32.totalorder %s4238_s1, %s3148_s27  ;;  %s28_s24 = int_to_ptr.vmem [resolvable:$true] %s27_s24 }
  0x15   :  { %p3152_p9 = scmp.lt.u32.totalorder %s3148_s27, %s4238_s1 }
  0x17   :  { %p3154_p10 = pnand %p3152_p9, %p3149_p8 }
  0x19   :  { %3157 = shalt.err (!%p3154_p10)
}
  0x1a   :  { %s3158_s4 = scalar_lea.vmem %s28_s24, 6144  ;;  %p3163_p12 = scmp.lt.s32.totalorder %s28_s24, %s28_s24 }
  0x1b   :  { %p3159_p11 = scmp.ne.s32.totalorder %s28_s24, %s3158_s4  ;;  %p3164_p13 = scmp.lt.s32.totalorder %s3158_s4, %s3158_s4 }
  0x1d   :  { %p3165_p0 = por %p3164_p13, %p3163_p12 }
  0x1f   :  { %p3166_p1 = pnand %p3165_p0, %p3159_p11 }
  0x21   :  { %3169 = shalt.err (!%p3166_p1)
}
  0x22   :  { %s3190_s0 = smov 384   ;;  %s3191_s5 = smov 24  }
  0x23   :  { %33 = dma.hbm_to_vmem [thread:$0]  %s4238_s1, 6144, %s28_s24, [#allocation6], %s3190_s0, %s3190_s0, %s3191_s5  }
  0x24   :  { %3180 = dma.done.wait [#allocation3], 1024  }
  0x25   :  { %3181 = vsyncadd [#allocation3], 4294966272 }
  0x26   :  { %3182 = dma.done.wait [#allocation6], 6144  }
  0x27   :  { %3183 = vsyncadd [#allocation6], 4294961152  ;;  %v4244_v0 = vmov 0.0   ;;  %v49_v1 = vld [vmem:[#allocation5 + $0x8] sm:$0xff]  ;;  %v52_v2 = vld [vmem:[#allocation5 + $0x20] sm:$0xff]  ;;  %s3170_s11 = scalar_lea.hbm %s4239_s2, 16 }
  0x28   :  { %192 = vmatprep.mubr.f32.mxu0 %v4244_v0  ;;  %v3234_v3 = vld [vmem:[#allocation5 + $0x10] sm:$0xff]  ;;  %v96_v4 = vand.u32 4294901760, %v49_v1  ;;  %v100_v5 = vand.u32 4294901760, %v52_v2  ;;  %v3236_v6 = vld [vmem:[#allocation5 + $0x28] sm:$0xff]  ;;  %v48_v8 = vld [vmem:[#allocation5] sm:$0xff]  ;;  %p3171_p2 = scmp.ne.s32.totalorder %s4239_s2, %s3170_s11  ;;  %p3174_p3 = scmp.lt.u32.totalorder %s3170_s11, %s4239_s2 }
  0x29   :  { %v4249_v7 = vand.u32 4294901760, %v3234_v3  ;;  %v51_v9 = vld [vmem:[#allocation5 + $0x18] sm:$0xff]  ;;  %v4248_v10 = vand.u32 4294901760, %v3236_v6  ;;  %v98_v11 = vand.u32 4294901760, %v48_v8  ;;  %v58_v14 = vld [vmem:[#allocation5 + $0x50] sm:$0xff]  ;;  %v3240_v15 = vld [vmem:[#allocation5 + $0x40] sm:$0xff] }
  0x2a   :  { %v102_v12 = vand.u32 4294901760, %v51_v9  ;;  %v55_v13 = vld [vmem:[#allocation5 + $0x38] sm:$0xff]  ;;  %v3242_v16 = vpack.c.bf16 %v100_v5, %v96_v4  ;;  %v3244_v17 = vsub.f32 %v49_v1, %v96_v4  ;;  %v3246_v18 = vsub.f32 %v52_v2, %v100_v5  ;;  %v54_v21 = vld [vmem:[#allocation5 + $0x30] sm:$0xff]  ;;  %v57_v22 = vld [vmem:[#allocation5 + $0x48] sm:$0xff]  ;;  %p3176_p4 = pnand %p3174_p3, %p3171_p2 }
  0x2b   :  { %v104_v19 = vand.u32 4294901760, %v55_v13  ;;  %v3248_v20 = vld [vmem:[#allocation5 + $0x58] sm:$0xff]  ;;  %v3254_v23 = vpack.c.bf16 %v4248_v10, %v4249_v7  ;;  %v3258_v25 = vsub.f32 %v48_v8, %v98_v11  ;;  %v61_v27 = vld [vmem:[#allocation5 + $0x68] sm:$0xff]  ;;  %v64_v28 = vld [vmem:[#allocation5 + $0x80] sm:$0xff]  ;;  %v108_v30 = vand.u32 4294901760, %v58_v14 }
  0x2c   :  { %4413 = vst [vmem:[#allocation11_spill] sm:$0xff] %v3242_v16  ;;  %v3256_v24 = vpack.c.bf16 %v102_v12, %v98_v11  ;;  %v3260_v26 = vsub.f32 %v51_v9, %v102_v12  ;;  %v3262_v29 = vld [vmem:[#allocation5 + $0x70] sm:$0xff]  ;;  %2637 = vmatprep.subr.bf16.mxu0 %v3242_v16  ;;  %v4247_v32 = vand.u32 4294901760, %v3240_v15  ;;  %v4246_v33 = vand.u32 4294901760, %v3248_v20  ;;  %v3269_v34 = vld [vmem:[#allocation5 + $0x88] sm:$0xff]  ;;  %v60_v39 = vld [vmem:[#allocation5 + $0x60] sm:$0xff] }
  0x2d   :  { %4414 = vst [vmem:[#allocation12_spill] sm:$0xff] %v3254_v23  ;;  %4416 = vst [vmem:[#allocation14_spill] sm:$0xff] %v3258_v25  ;;  %v3265_v31 = vsub.f32 %v55_v13, %v104_v19  ;;  %2829 = vmatprep.subr.bf16.mxu1 %v3254_v23  ;;  %v106_v35 = vand.u32 4294901760, %v54_v21  ;;  %v110_v36 = vand.u32 4294901760, %v57_v22  ;;  %v112_v37 = vand.u32 4294901760, %v61_v27  ;;  %v63_v40 = vld [vmem:[#allocation5 + $0x78] sm:$0xff] }
  0x2e   :  { %4415 = vst [vmem:[#allocation13_spill] sm:$0xff] %v3256_v24  ;;  %2639 = vmatpush1.bf16.msra.mxu0 %v3256_v24  ;;  %v116_v38 = vand.u32 4294901760, %v64_v28  ;;  %2831 = vmatpush3.bf16.msra.mxu1 %v3254_v23  ;;  %v3274_v41 = vpack.c.bf16 %v108_v30, %v104_v19  ;;  %v3276_v42 = vsub.f32 %v58_v14, %v108_v30  ;;  %v4243_v44 = vand.u32 4294901760, %v3262_v29  ;;  %v67_v45 = vld [vmem:[#allocation5 + $0x98] sm:$0xff]  ;;  %v70_v46 = vld [vmem:[#allocation5 + $0xb0] sm:$0xff]  ;;  %v3285_v47 = vld [vmem:[#allocation5 + $0xa0] sm:$0xff] }
  0x2f   :  { %v3282_v43 = vpack.c.bf16 %v4246_v33, %v4247_v32  ;;  %v3287_v48 = vpack.c.bf16 %v110_v36, %v106_v35  ;;  %v3289_v49 = vsub.f32 %v54_v21, %v106_v35  ;;  %v3291_v50 = vsub.f32 %v57_v22, %v110_v36  ;;  %v3295_v52 = vld [vmem:[#allocation5 + $0xb8] sm:$0xff]  ;;  %v66_v53 = vld [vmem:[#allocation5 + $0x90] sm:$0xff]  ;;  %v69_v62 = vld [vmem:[#allocation5 + $0xa8] sm:$0xff] }
  0x30   :  { %4417 = vst [vmem:[#allocation15_spill] sm:$0xff] %v3274_v41  ;;  %v3293_v51 = vpack.c.bf16 %v116_v38, %v112_v37  ;;  %2641 = vmatprep.subr.bf16.mxu0 %v3274_v41  ;;  %v3299_v54 = vsub.f32 %v61_v27, %v112_v37  ;;  %v3301_v55 = vsub.f32 %v64_v28, %v116_v38  ;;  %v4242_v56 = vand.u32 4294901760, %v3269_v34  ;;  %v73_v63 = vld [vmem:[#allocation5 + $0xc8] sm:$0xff]  ;;  %v76_v8 = vld [vmem:[#allocation5 + $0xe0] sm:$0xff]  ;;  %v3317_v9 = vld [vmem:[#allocation5 + $0xd0] sm:$0xff] }
  0x31   :  { %4418 = vst [vmem:[#allocation16_spill] sm:$0xff] %v3282_v43  ;;  %4419 = vst [vmem:[#allocation17_spill] sm:$0xff] %v3287_v48  ;;  %2833 = vmatprep.subr.bf16.mxu1 %v3282_v43  ;;  %v114_v57 = vand.u32 4294901760, %v60_v39  ;;  %v118_v58 = vand.u32 4294901760, %v63_v40  ;;  %v120_v59 = vand.u32 4294901760, %v67_v45  ;;  %v124_v60 = vand.u32 4294901760, %v70_v46 }
  0x32   :  { %4420 = vst [vmem:[#allocation18_spill] sm:$0xff] %v3293_v51  ;;  %2643 = vmatpush1.bf16.msra.mxu0 %v3287_v48  ;;  %v4241_v61 = vand.u32 4294901760, %v3285_v47  ;;  %2835 = vmatpush3.bf16.msra.mxu1 %v3282_v43  ;;  %v3312_v1 = vpack.c.bf16 %v4242_v56, %v4243_v44  ;;  %v4240_v4 = vand.u32 4294901760, %v3295_v52  ;;  %v122_v5 = vand.u32 4294901760, %v66_v53  ;;  %v3319_v11 = vld [vmem:[#allocation5 + $0xe8] sm:$0xff]  ;;  %v72_v21 = vld [vmem:[#allocation5 + $0xc0] sm:$0xff] }
  0x33   :  { %2645 = vmatprep.subr.bf16.mxu0 %v3293_v51  ;;  %v3314_v2 = vsub.f32 %v60_v39, %v114_v57  ;;  %v3321_v12 = vpack.c.bf16 %v118_v58, %v114_v57  ;;  %v3323_v13 = vsub.f32 %v63_v40, %v118_v58  ;;  %v3325_v14 = vpack.c.bf16 %v124_v60, %v120_v59  ;;  %v75_v22 = vld [vmem:[#allocation5 + $0xd8] sm:$0xff]  ;;  %v88_v0 = vld [vmem:[#allocation5 + $0x140] sm:$0xff]  ;;  %v94_v51 = vld [vmem:[#allocation5 + $0x170] sm:$0xff] }
  0x34   :  { %4421 = vst [vmem:[#allocation19_spill] sm:$0xff] %v3312_v1  ;;  %v3327_v19 = vsub.f32 %v67_v45, %v120_v59  ;;  %2837 = vmatprep.subr.bf16.mxu1 %v3312_v1  ;;  %v3330_v27 = vsub.f32 %v70_v46, %v124_v60  ;;  %v3336_v28 = vpack.c.bf16 %v4240_v4, %v4241_v61  ;;  %v126_v30 = vand.u32 4294901760, %v69_v62  ;;  %v79_v40 = vld [vmem:[#allocation5 + $0xf8] sm:$0xff]  ;;  %v82_v45 = vld [vmem:[#allocation5 + $0x110] sm:$0xff]  ;;  %v3349_v59 = vld [vmem:[#allocation5 + $0x100] sm:$0xff] }
  0x35   :  { %4422 = vst [vmem:[#allocation20_spill] sm:$0xff] %v3321_v12  ;;  %4423 = vst [vmem:[#allocation21_spill] sm:$0xff] %v3325_v14  ;;  %v3338_v35 = vsub.f32 %v66_v53, %v122_v5  ;;  %v128_v36 = vand.u32 4294901760, %v73_v63  ;;  %v132_v37 = vand.u32 4294901760, %v76_v8  ;;  %v4251_v38 = vand.u32 4294901760, %v3317_v9  ;;  %v3351_v60 = vld [vmem:[#allocation5 + $0x118] sm:$0xff] }
  0x36   :  { %4424 = vst [vmem:[#allocation22_spill] sm:$0xff] %v3336_v28  ;;  %2647 = vmatpush1.bf16.msra.mxu0 %v3321_v12  ;;  %v4250_v39 = vand.u32 4294901760, %v3319_v11  ;;  %2839 = vmatpush3.bf16.msra.mxu1 %v3312_v1  ;;  %v3345_v46 = vpack.c.bf16 %v126_v30, %v122_v5  ;;  %v3347_v57 = vsub.f32 %v69_v62, %v126_v30  ;;  %v130_v53 = vand.u32 4294901760, %v72_v21  ;;  %v78_v4 = vld [vmem:[#allocation5 + $0xf0] sm:$0xff]  ;;  %v81_v5 = vld [vmem:[#allocation5 + $0x108] sm:$0xff]  ;;  %v91_v1 = vld [vmem:[#allocation5 + $0x158] sm:$0xff] }
  0x37   :  { %2649 = vmatprep.subr.bf16.mxu0 %v3325_v14  ;;  %v134_v58 = vand.u32 4294901760, %v75_v22  ;;  %2841 = vmatprep.subr.bf16.mxu1 %v3336_v28  ;;  %v3354_v61 = vpack.c.bf16 %v132_v37, %v128_v36  ;;  %v3356_v56 = vsub.f32 %v73_v63, %v128_v36  ;;  %v3358_v44 = vsub.f32 %v76_v8, %v132_v37  ;;  %v85_v30 = vld [vmem:[#allocation5 + $0x128] sm:$0xff]  ;;  %v87_v14 = vld [vmem:[#allocation5 + $0x138] sm:$0xff]  ;;  %v3396_v48 = vld [vmem:[#allocation5 + $0x160] sm:$0xff] }
  0x38   :  { %4425 = vst [vmem:[#allocation23_spill] sm:$0xff] %v3345_v46  ;;  %v3364_v62 = vpack.c.bf16 %v4250_v39, %v4251_v38  ;;  %v3368_v32 = vsub.f32 %v72_v21, %v130_v53  ;;  %v136_v7 = vand.u32 4294901760, %v79_v40  ;;  %v140_v63 = vand.u32 4294901760, %v82_v45  ;;  %v3375_v39 = vld [vmem:[#allocation5 + $0x130] sm:$0xff] }
  0x39   :  { %4426 = vst [vmem:[#allocation24_spill] sm:$0xff] %v3354_v61  ;;  %v3366_v33 = vpack.c.bf16 %v134_v58, %v130_v53  ;;  %v3370_v10 = vsub.f32 %v75_v22, %v134_v58  ;;  %v138_v37 = vand.u32 4294901760, %v78_v4  ;;  %4429 = vst [vmem:[#allocation27_spill] sm:$0xff] %v3375_v39  ;;  %v142_v21 = vand.u32 4294901760, %v81_v5  ;;  %v3381_v58 = vld [vmem:[#allocation5 + $0x148] sm:$0xff]  ;;  %v90_v24 = vld [vmem:[#allocation5 + $0x150] sm:$0xff] }
  0x3a   :  { %4427 = vst [vmem:[#allocation25_spill] sm:$0xff] %v3364_v62  ;;  %2651 = vmatpush1.bf16.msra.mxu0 %v3345_v46  ;;  %2843 = vmatpush3.bf16.msra.mxu1 %v3336_v28  ;;  %v3379_v38 = vsub.f32 %v79_v40, %v136_v7  ;;  %v144_v22 = vand.u32 4294901760, %v85_v30  ;;  %v148_v53 = vand.u32 4294901760, %v88_v0  ;;  %v84_v46 = vld [vmem:[#allocation5 + $0x120] sm:$0xff]  ;;  %v3384_v8 = vpack.c.bf16 %v140_v63, %v136_v7 }
  0x3b   :  { %4428 = vst [vmem:[#allocation26_spill] sm:$0xff] %v3366_v33  ;;  %2653 = vmatprep.subr.bf16.mxu0 %v3354_v61  ;;  %2845 = vmatprep.subr.bf16.mxu1 %v3364_v62  ;;  %v3386_v36 = vsub.f32 %v82_v45, %v140_v63  ;;  %v4431_v12 = vand.u32 4294901760, %v3349_v59  ;;  %v4432_v28 = vand.u32 4294901760, %v3351_v60  ;;  %v3394_v40 = vsub.f32 %v78_v4, %v138_v37  ;;  %v3406_v63 = vld [vmem:[#allocation5 + $0x178] sm:$0xff] }
  0x3c   :  { %4430 = vst [vmem:[#allocation28_spill] sm:$0xff] %v3384_v8  ;;  %v3398_v43 = vpack.c.bf16 %v142_v21, %v138_v37  ;;  %v3400_v41 = vsub.f32 %v81_v5, %v142_v21  ;;  %v3402_v7 = vpack.c.bf16 %v148_v53, %v144_v22  ;;  %v3404_v45 = vsub.f32 %v85_v30, %v144_v22  ;;  %v93_v22 = vld [vmem:[#allocation5 + $0x168] sm:$0xff] }
  0x3d   :  { %v3392_v61 = vpack.c.bf16 %v4432_v28, %v4431_v12  ;;  %4434 = vst [vmem:[#allocation30_spill] sm:$0xff] %v3394_v40  ;;  %v3409_v12 = vsub.f32 %v88_v0, %v148_v53  ;;  %v4289_v4 = vand.u32 4294901760, %v3375_v39  ;;  %v4288_v28 = vand.u32 4294901760, %v3381_v58 }
  0x3e   :  { %4435 = vst [vmem:[#allocation31_spill] sm:$0xff] %v3398_v43  ;;  %4436 = vst [vmem:[#allocation32_spill] sm:$0xff] %v3400_v41  ;;  %2655 = vmatpush1.bf16.msra.mxu0 %v3366_v33  ;;  %v146_v23 = vand.u32 4294901760, %v84_v46  ;;  %2847 = vmatpush3.bf16.msra.mxu1 %v3364_v62  ;;  %v150_v5 = vand.u32 4294901760, %v87_v14  ;;  %v152_v37 = vand.u32 4294901760, %v91_v1  ;;  %v156_v30 = vand.u32 4294901760, %v94_v51 }
  0x3f   :  { %4433 = vst [vmem:[#allocation29_spill] sm:$0xff] %v3392_v61  ;;  %4437 = vst [vmem:[#allocation33_spill] sm:$0xff] %v3402_v7  ;;  %2657 = vmatprep.subr.bf16.mxu0 %v3384_v8  ;;  %2849 = vmatprep.subr.bf16.mxu1 %v3392_v61  ;;  %v3421_v0 = vpack.c.bf16 %v4288_v28, %v4289_v4  ;;  %v4291_v33 = vand.u32 4294901760, %v3406_v63  ;;  %v154_v62 = vand.u32 4294901760, %v90_v24  ;;  %v40_v8 = vld [vmem:[#allocation2] sm:$0xff]  ;;  %v4444_v28 = vand.u32 4294901760, %v3396_v48 }
  0x40   :  { %4438 = vst [vmem:[#allocation34_spill] sm:$0xff] %v3404_v45  ;;  %4439 = vst [vmem:[#allocation35_spill] sm:$0xff] %v3409_v12  ;;  %v3423_v53 = vsub.f32 %v84_v46, %v146_v23  ;;  %v3426_v16 = vpack.c.bf16 %v150_v5, %v146_v23  ;;  %v3428_v12 = vsub.f32 %v87_v14, %v150_v5  ;;  %v158_v4 = vand.u32 4294901760, %v93_v22 }
  0x41   :  { %4440 = vst [vmem:[#allocation36_spill] sm:$0xff] %v3421_v0  ;;  %v3430_v21 = vpack.c.bf16 %v156_v30, %v152_v37  ;;  %v3432_v45 = vsub.f32 %v91_v1, %v152_v37  ;;  %v3435_v39 = vsub.f32 %v94_v51, %v156_v30  ;;  %v3441_v46 = vpack.c.bf16 %v4291_v33, %v4444_v28  ;;  %v41_v28 = vld [vmem:[#allocation2 + $0x8] sm:$0xff] }
  0x42   :  { %4441 = vst [vmem:[#allocation37_spill] sm:$0xff] %v3423_v53  ;;  %4442 = vst [vmem:[#allocation38_spill] sm:$0xff] %v3426_v16  ;;  %2659 = vmatpush1.bf16.msra.mxu0 %v3398_v43  ;;  %v3443_v53 = vsub.f32 %v90_v24, %v154_v62  ;;  %2851 = vmatpush3.bf16.msra.mxu1 %v3392_v61  ;;  %v3447_v23 = vand.u32 4294901760, %v40_v8  ;;  %v4448_v14 = vand.u32 4294901760, %v3234_v3  ;;  %v4452_v30 = vand.u32 4294901760, %v3236_v6 }
  0x43   :  { %4443 = vst [vmem:[#allocation39_spill] sm:$0xff] %v3430_v21  ;;  %4445 = vst [vmem:[#allocation40_spill] sm:$0xff] %v3441_v46  ;;  %2661 = vmatprep.subr.bf16.mxu0 %v3402_v7  ;;  %2853 = vmatprep.subr.bf16.mxu1 %v3421_v0  ;;  %v3457_v24 = vpack.c.bf16 %v158_v4, %v154_v62  ;;  %v3459_v37 = vsub.f32 %v93_v22, %v158_v4  ;;  %v4296_v1 = vand.u32 4294901760, %v3258_v25 }
  0x44   :  { %4446 = vst [vmem:[#allocation41_spill] sm:$0xff] %v3443_v53  ;;  %4447 = vst [vmem:[#allocation42_spill] sm:$0xff] %v3447_v23  ;;  %v3454_v5 = vsub.f32 %v3234_v3, %v4448_v14  ;;  %v3464_v33 = vsub.f32 %v3236_v6, %v4452_v30  ;;  %v3468_v51 = vsub.f32 %v40_v8, %v3447_v23  ;;  %v4454_v3 = vand.u32 4294901760, %v3244_v17 }
  0x45   :  { %4450 = vst [vmem:[#allocation44_spill] sm:$0xff] %v3457_v24  ;;  %4451 = vst [vmem:[#allocation45_spill] sm:$0xff] %v3459_v37  ;;  %v4455_v7 = vand.u32 4294901760, %v3246_v18  ;;  %v282_v22 = vsub.f32 %v3258_v25, %v4296_v1  ;;  %v3483_v30 = vand.u32 4294901760, %v41_v28 }
  0x46   :  { %4449 = vst [vmem:[#allocation43_spill] sm:$0xff] %v3454_v5  ;;  %4453 = vst [vmem:[#allocation46_spill] sm:$0xff] %v3468_v51  ;;  %v276_v14 = vsub.f32 %v3244_v17, %v4454_v3  ;;  %2663 = vmatpush1.bf16.msra.mxu0 %v3426_v16  ;;  %2855 = vmatpush3.bf16.msra.mxu1 %v3421_v0  ;;  %v4458_v16 = vand.u32 4294901760, %v3454_v5  ;;  %v4459_v1 = vand.u32 4294901760, %v3464_v33  ;;  %v4460_v0 = vand.u32 4294901760, %v3260_v26 }
  0x47   :  { %v288_v62 = vsub.f32 %v3246_v18, %v4455_v7  ;;  %4456 = vst [vmem:[#allocation47_spill] sm:$0xff] %v3483_v30  ;;  %2665 = vmatprep.subr.bf16.mxu0 %v3430_v21  ;;  %v3488_v7 = vand.u32 4294901760, %v3468_v51  ;;  %2857 = vmatprep.subr.bf16.mxu1 %v3441_v46  ;;  %v283_v43 = vand.u32 4294901760, %v282_v22  ;;  %v3501_v61 = vsub.f32 %v41_v28, %v3483_v30 }
  0x48   :  { %v277_v3 = vand.u32 4294901760, %v276_v14  ;;  %v1405_v6 = vsub.f32 %v3454_v5, %v4458_v16  ;;  %v1412_v8 = vsub.f32 %v3464_v33, %v4459_v1  ;;  %v294_v21 = vsub.f32 %v3260_v26, %v4460_v0 }
  0x49   :  { %4457 = vst [vmem:[#allocation48_spill] sm:$0xff] %v3488_v7  ;;  %v289_v4 = vand.u32 4294901760, %v288_v62  ;;  %4461 = vst [vmem:[#allocation49_spill] sm:$0xff] %v3501_v61  ;;  %v196_v14 = vsub.f32 %v3468_v51, %v3488_v7  ;;  %v4313_v16 = vand.u32 4294901760, %v3265_v31  ;;  %v3508_v1 = vand.u32 4294901760, %v3501_v61 }
  0x4a   :  { %v1406_v25 = vand.u32 4294901760, %v1405_v6  ;;  %2667 = vmatpush1.bf16.msra.mxu0 %v3457_v24  ;;  %v1413_v5 = vand.u32 4294901760, %v1412_v8  ;;  %v295_v23 = vand.u32 4294901760, %v294_v21  ;;  %2859 = vmatpush3.bf16.msra.mxu1 %v3441_v46  ;;  %v4464_v21 = vand.u32 4294901760, %v3248_v20 }
  0x4b   :  { %v2668_v62 = vpack.c.bf16 %v289_v4, %v277_v3  ;;  %4462 = vst [vmem:[#allocation50_spill] sm:$0xff] %v3508_v1  ;;  %v197_v0 = vand.u32 4294901760, %v196_v14  ;;  %v300_v28 = vsub.f32 %v3265_v31, %v4313_v16  ;;  %v4463_v4 = vand.u32 4294901760, %v3240_v15  ;;  %v42_v3 = vld [vmem:[#allocation2 + $0x10] sm:$0xff] }
  0x4c   :  { %v3523_v8 = vsub.f32 %v3248_v20, %v4464_v21  ;;  %v2860_v22 = vpack.c.bf16 %v1413_v5, %v1406_v25  ;;  %v2670_v24 = vpack.c.bf16 %v295_v23, %v283_v43  ;;  %v206_v14 = vsub.f32 %v3501_v61, %v3508_v1 }
  0x4d   :  { %2669 = vmatprep.subr.bf16.mxu0 %v2668_v62  ;;  %v3518_v6 = vsub.f32 %v3240_v15, %v4463_v4  ;;  %v4465_v62 = vand.u32 4294901760, %v3276_v42  ;;  %198 = vmatmul.mubr.f32.vlgmr.msra.gmra.mrb[0].mxu0 %v197_v0  ;;  %v301_v46 = vand.u32 4294901760, %v300_v28  ;;  %v4324_v20 = vand.u32 4294901760, %v3289_v49 }
  0x4e   :  { %2404 = vmatprep.mubr.f32.mxu1 %v197_v0  ;;  %v4319_v4 = vand.u32 4294901760, %v3523_v8  ;;  %2861 = vmatprep.subr.bf16.mxu1 %v2860_v22  ;;  %v207_v25 = vand.u32 4294901760, %v206_v14  ;;  %v4326_v23 = vand.u32 4294901760, %v3291_v50  ;;  %v3534_v5 = vand.u32 4294901760, %v42_v3 }
  0x4f   :  { %v312_v16 = vsub.f32 %v3276_v42, %v4465_v62  ;;  %v4318_v15 = vand.u32 4294901760, %v3518_v6  ;;  %2671 = vmatpush1.bf16.msra.mxu0 %v2670_v24  ;;  %v4467_v21 = vmov 0.0   ;;  %v306_v24 = vsub.f32 %v3289_v49, %v4324_v20 }
  0x50   :  { %4466 = vst [vmem:[#allocation51_spill] sm:$0xff] %v3534_v5  ;;  %202 = vmatprep.mubr.f32.mxu0 %v4467_v21  ;;  %v1426_v28 = vsub.f32 %v3523_v8, %v4319_v4  ;;  %2405 = vmatmul.mubr.f32.vlgmr.msra.gmra.mrb[0].mxu1 %v207_v25  ;;  %v318_v62 = vsub.f32 %v3291_v50, %v4326_v23 }
  0x51   :  { %v313_v43 = vand.u32 4294901760, %v312_v16  ;;  %v1419_v0 = vsub.f32 %v3518_v6, %v4318_v15  ;;  %v4325_v16 = vand.u32 4294901760, %v3299_v54  ;;  %v3551_v1 = vsub.f32 %v42_v3, %v3534_v5  ;;  %2863 = vmatpush3.bf16.msra.mxu1 %v2860_v22  ;;  %208 = vmatmul.mubr.f32.gmra.mrb[2].mxu0 %v207_v25 }
  0x52   :  { %v4329_v15 = vand.u32 4294901760, %v3301_v55  ;;  %v1427_v7 = vand.u32 4294901760, %v1426_v28  ;;  %v307_v61 = vand.u32 4294901760, %v306_v24  ;;  %212 = vmatprep.mubr.f32.mxu0 %v4467_v21  ;;  %v4470_v22 = vand.u32 4294901760, %v3262_v29 }
  0x53   :  { %v2672_v14 = vpack.c.bf16 %v313_v43, %v301_v46  ;;  %4468 = vst [vmem:[#allocation52_spill] sm:$0xff] %v3551_v1  ;;  %v1420_v4 = vand.u32 4294901760, %v1419_v0  ;;  %v324_v20 = vsub.f32 %v3299_v54, %v4325_v16  ;;  %v319_v46 = vand.u32 4294901760, %v318_v62  ;;  %v43_v0 = vld [vmem:[#allocation2 + $0x18] sm:$0xff] }
  0x54   :  { %v3559_v43 = vand.u32 4294901760, %v3551_v1  ;;  %v336_v3 = vsub.f32 %v3301_v55, %v4329_v15  ;;  %v3567_v25 = vsub.f32 %v3262_v29, %v4470_v22  ;;  %v4332_v16 = vand.u32 4294901760, %v3314_v2 }
  0x55   :  { %2673 = vmatprep.subr.bf16.mxu0 %v2672_v14  ;;  %v2864_v28 = vpack.c.bf16 %v1427_v7, %v1420_v4  ;;  %v325_v24 = vand.u32 4294901760, %v324_v20  ;;  %v4471_v14 = vand.u32 4294901760, %v3269_v34  ;;  %v2674_v23 = vpack.c.bf16 %v319_v46, %v307_v61 }
  0x56   :  { %4469 = vst [vmem:[#allocation53_spill] sm:$0xff] %v3559_v43  ;;  %v216_v51 = vsub.f32 %v3551_v1, %v3559_v43  ;;  %v337_v15 = vand.u32 4294901760, %v336_v3  ;;  %v4334_v5 = vand.u32 4294901760, %v3567_v25  ;;  %v330_v7 = vsub.f32 %v3314_v2, %v4332_v16 }
  0x57   :  { %v3572_v62 = vsub.f32 %v3269_v34, %v4471_v14  ;;  %2865 = vmatprep.subr.bf16.mxu1 %v2864_v28  ;;  %v4336_v4 = vand.u32 4294901760, %v3323_v13  ;;  %v3583_v34 = vand.u32 4294901760, %v43_v0  ;;  %2675 = vmatpush1.bf16.msra.mxu0 %v2674_v23  ;;  %v4335_v3 = vand.u32 4294901760, %v3327_v19 }
  0x58   :  { %2867 = vmatpush3.bf16.msra.mxu1 %v2864_v28  ;;  %v217_v61 = vand.u32 4294901760, %v216_v51  ;;  %v2676_v20 = vpack.c.bf16 %v337_v15, %v325_v24  ;;  %v1433_v46 = vsub.f32 %v3567_v25, %v4334_v5  ;;  %v331_v14 = vand.u32 4294901760, %v330_v7 }
  0x59   :  { %v4333_v29 = vand.u32 4294901760, %v3572_v62  ;;  %4472 = vst [vmem:[#allocation54_spill] sm:$0xff] %v3583_v34  ;;  %v342_v16 = vsub.f32 %v3323_v13, %v4336_v4  ;;  %v3596_v23 = vsub.f32 %v43_v0, %v3583_v34  ;;  %v348_v15 = vsub.f32 %v3327_v19, %v4335_v3 }
  0x5a   :  { %218 = vmatmul.mubr.f32.gmra.mrb[4].mxu0 %v217_v61  ;;  %2677 = vmatprep.subr.bf16.mxu0 %v2676_v20  ;;  %v1434_v51 = vand.u32 4294901760, %v1433_v46  ;;  %v4344_v28 = vand.u32 4294901760, %v3330_v27  ;;  %v4474_v24 = vand.u32 4294901760, %v3285_v47  ;;  %v4476_v20 = vand.u32 4294901760, %v3295_v52 }
  0x5b   :  { %v1440_v22 = vsub.f32 %v3572_v62, %v4333_v29  ;;  %4473 = vst [vmem:[#allocation55_spill] sm:$0xff] %v3596_v23  ;;  %v343_v5 = vand.u32 4294901760, %v342_v16  ;;  %222 = vmatprep.mubr.f32.mxu0 %v4467_v21  ;;  %v3609_v0 = vand.u32 4294901760, %v3596_v23  ;;  %2407 = vmatprep.mubr.f32.mxu1 %v217_v61  ;;  %v349_v3 = vand.u32 4294901760, %v348_v15 }
  0x5c   :  { %v3605_v7 = vsub.f32 %v3285_v47, %v4474_v24  ;;  %v3614_v46 = vsub.f32 %v3295_v52, %v4476_v20  ;;  %v360_v4 = vsub.f32 %v3330_v27, %v4344_v28  ;;  %v4345_v16 = vand.u32 4294901760, %v3338_v35 }
  0x5d   :  { %v1441_v29 = vand.u32 4294901760, %v1440_v22  ;;  %4475 = vst [vmem:[#allocation56_spill] sm:$0xff] %v3609_v0  ;;  %v44_v22 = vld [vmem:[#allocation2 + $0x20] sm:$0xff]  ;;  %v2678_v43 = vpack.c.bf16 %v343_v5, %v331_v14  ;;  %v226_v1 = vsub.f32 %v3596_v23, %v3609_v0  ;;  %v4350_v20 = vand.u32 4294901760, %v3347_v57 }
  0x5e   :  { %v4343_v47 = vand.u32 4294901760, %v3605_v7  ;;  %v4348_v34 = vand.u32 4294901760, %v3614_v46  ;;  %v361_v52 = vand.u32 4294901760, %v360_v4  ;;  %v354_v15 = vsub.f32 %v3338_v35, %v4345_v16 }
  0x5f   :  { %v2868_v24 = vpack.c.bf16 %v1441_v29, %v1434_v51  ;;  %2679 = vmatpush1.bf16.msra.mxu0 %v2678_v43  ;;  %v227_v29 = vand.u32 4294901760, %v226_v1  ;;  %v3634_v14 = vand.u32 4294901760, %v44_v22  ;;  %v4349_v4 = vand.u32 4294901760, %v3356_v56 }
  0x60   :  { %v1447_v61 = vsub.f32 %v3605_v7, %v4343_v47  ;;  %v1454_v5 = vsub.f32 %v3614_v46, %v4348_v34  ;;  %v2680_v51 = vpack.c.bf16 %v361_v52, %v349_v3  ;;  %v355_v28 = vand.u32 4294901760, %v354_v15 }
  0x61   :  { %2869 = vmatprep.subr.bf16.mxu1 %v2868_v24  ;;  %4477 = vst [vmem:[#allocation57_spill] sm:$0xff] %v3634_v14  ;;  %v366_v16 = vsub.f32 %v3347_v57, %v4350_v20  ;;  %228 = vmatmul.mubr.f32.gmra.mrb[6].mxu0 %v227_v29  ;;  %v3641_v1 = vsub.f32 %v44_v22, %v3634_v14  ;;  %v4352_v34 = vand.u32 4294901760, %v3358_v44  ;;  %v4351_v15 = vand.u32 4294901760, %v3368_v32  ;;  %v4490_v14 = vld [vmem:[#allocation35_spill] sm:$0xff] }
  0x62   :  { %2871 = vmatpush3.bf16.msra.mxu1 %v2868_v24  ;;  %v1448_v47 = vand.u32 4294901760, %v1447_v61  ;;  %v1455_v0 = vand.u32 4294901760, %v1454_v5  ;;  %v372_v43 = vsub.f32 %v3356_v56, %v4349_v4  ;;  %2681 = vmatprep.subr.bf16.mxu0 %v2680_v51  ;;  %v4479_v24 = vand.u32 4294901760, %v3317_v9  ;;  %v45_v5 = vld [vmem:[#allocation2 + $0x28] sm:$0xff] }
  0x63   :  { %4478 = vst [vmem:[#allocation58_spill] sm:$0xff] %v3641_v1  ;;  %2408 = vmatmul.mubr.f32.gmra.mrb[2].mxu1 %v227_v29  ;;  %v367_v3 = vand.u32 4294901760, %v366_v16  ;;  %232 = vmatprep.mubr.f32.mxu0 %v4467_v21  ;;  %v4480_v61 = vand.u32 4294901760, %v3319_v11  ;;  %v3660_v29 = vand.u32 4294901760, %v3641_v1  ;;  %v384_v51 = vsub.f32 %v3358_v44, %v4352_v34 }
  0x64   :  { %v3651_v52 = vsub.f32 %v3317_v9, %v4479_v24  ;;  %v2872_v4 = vpack.c.bf16 %v1455_v0, %v1448_v47  ;;  %v373_v16 = vand.u32 4294901760, %v372_v43  ;;  %v4362_v43 = vand.u32 4294901760, %v3370_v10 }
  0x65   :  { %v3656_v22 = vsub.f32 %v3319_v11, %v4480_v61  ;;  %4481 = vst [vmem:[#allocation59_spill] sm:$0xff] %v3660_v29  ;;  %v2682_v20 = vpack.c.bf16 %v367_v3, %v355_v28  ;;  %v378_v11 = vsub.f32 %v3368_v32, %v4351_v15  ;;  %v236_v0 = vsub.f32 %v3641_v1, %v3660_v29 }
  0x66   :  { %v4359_v9 = vand.u32 4294901760, %v3651_v52  ;;  %2873 = vmatprep.subr.bf16.mxu1 %v2872_v4  ;;  %v385_v47 = vand.u32 4294901760, %v384_v51  ;;  %v3673_v61 = vand.u32 4294901760, %v45_v5  ;;  %v4361_v34 = vand.u32 4294901760, %v3379_v38 }
  0x67   :  { %v4360_v24 = vand.u32 4294901760, %v3656_v22  ;;  %2683 = vmatpush1.bf16.msra.mxu0 %v2682_v20  ;;  %2875 = vmatpush3.bf16.msra.mxu1 %v2872_v4  ;;  %v379_v15 = vand.u32 4294901760, %v378_v11  ;;  %v237_v23 = vand.u32 4294901760, %v236_v0  ;;  %v390_v51 = vsub.f32 %v3370_v10, %v4362_v43 }
  0x68   :  { %4482 = vst [vmem:[#allocation60_spill] sm:$0xff] %v3673_v61  ;;  %v1461_v28 = vsub.f32 %v3651_v52, %v4359_v9  ;;  %v2684_v29 = vpack.c.bf16 %v385_v47, %v373_v16  ;;  %v3686_v20 = vsub.f32 %v45_v5, %v3673_v61  ;;  %v396_v9 = vsub.f32 %v3379_v38, %v4361_v34 }
  0x69   :  { %v1468_v3 = vsub.f32 %v3656_v22, %v4360_v24  ;;  %v4365_v24 = vand.u32 4294901760, %v3386_v36  ;;  %238 = vmatmul.mubr.f32.gmra.mrb[8].mxu0 %v237_v23  ;;  %v391_v11 = vand.u32 4294901760, %v390_v51  ;;  %v4485_v0 = vand.u32 4294901760, %v3349_v59  ;;  %2410 = vmatprep.mubr.f32.mxu1 %v237_v23 }
  0x6a   :  { %4483 = vst [vmem:[#allocation61_spill] sm:$0xff] %v3686_v20  ;;  %v1462_v4 = vand.u32 4294901760, %v1461_v28  ;;  %2685 = vmatprep.subr.bf16.mxu0 %v2684_v29  ;;  %v3693_v16 = vand.u32 4294901760, %v3686_v20  ;;  %v4486_v5 = vand.u32 4294901760, %v3351_v60  ;;  %242 = vmatprep.mubr.f32.mxu0 %v4467_v21  ;;  %v397_v43 = vand.u32 4294901760, %v396_v9 }
  0x6b   :  { %v1469_v1 = vand.u32 4294901760, %v1468_v3  ;;  %v3698_v47 = vsub.f32 %v3349_v59, %v4485_v0  ;;  %v46_v3 = vld [vmem:[#allocation2 + $0x30] sm:$0xff]  ;;  %v408_v29 = vsub.f32 %v3386_v36, %v4365_v24  ;;  %v4370_v51 = vand.u32 4294901760, %v3394_v40 }
  0x6c   :  { %4484 = vst [vmem:[#allocation62_spill] sm:$0xff] %v3693_v16  ;;  %v3703_v28 = vsub.f32 %v3351_v60, %v4486_v5  ;;  %v2686_v61 = vpack.c.bf16 %v391_v11, %v379_v15  ;;  %v246_v59 = vsub.f32 %v3686_v20, %v3693_v16  ;;  %v3718_v5 = vand.u32 4294901760, %v46_v3 }
  0x6d   :  { %v2876_v34 = vpack.c.bf16 %v1469_v1, %v1462_v4  ;;  %v4371_v0 = vand.u32 4294901760, %v3698_v47  ;;  %v409_v1 = vand.u32 4294901760, %v408_v29  ;;  %v402_v9 = vsub.f32 %v3394_v40, %v4370_v51  ;;  %v4488_v29 = vld [vmem:[#allocation34_spill] sm:$0xff] }
  0x6e   :  { %v4374_v60 = vand.u32 4294901760, %v3703_v28  ;;  %v4375_v4 = vand.u32 4294901760, %v3400_v41  ;;  %4487 = vst [vmem:[#allocation63_spill] sm:$0xff] %v3718_v5  ;;  %2687 = vmatpush1.bf16.msra.mxu0 %v2686_v61  ;;  %v247_v23 = vand.u32 4294901760, %v246_v59  ;;  %v4376_v24 = vand.u32 4294901760, %v4488_v29 }
  0x6f   :  { %2877 = vmatprep.subr.bf16.mxu1 %v2876_v34  ;;  %v1475_v15 = vsub.f32 %v3698_v47, %v4371_v0  ;;  %v2688_v16 = vpack.c.bf16 %v409_v1, %v397_v43  ;;  %v403_v20 = vand.u32 4294901760, %v402_v9  ;;  %v3731_v61 = vsub.f32 %v46_v3, %v3718_v5  ;;  %v4492_v9 = vld [vmem:[#allocation27_spill] sm:$0xff]  ;;  %v4496_v5 = vld [vmem:[#allocation37_spill] sm:$0xff] }
  0x70   :  { %2879 = vmatpush3.bf16.msra.mxu1 %v2876_v34  ;;  %v1482_v11 = vsub.f32 %v3703_v28, %v4374_v60  ;;  %v414_v51 = vsub.f32 %v3400_v41, %v4375_v4  ;;  %248 = vmatmul.mubr.f32.gmra.mrb[10].mxu0 %v247_v23  ;;  %v420_v0 = vsub.f32 %v4488_v29, %v4376_v24  ;;  %v4493_v3 = vand.u32 4294901760, %v4492_v9  ;;  %v47_v24 = vld [vmem:[#allocation2 + $0x38] sm:$0xff] }
  0x71   :  { %4489 = vst [vmem:[#allocation64_spill] sm:$0xff] %v3731_v61  ;;  %v1476_v34 = vand.u32 4294901760, %v1475_v15  ;;  %2411 = vmatmul.mubr.f32.gmra.mrb[4].mxu1 %v247_v23  ;;  %2689 = vmatprep.subr.bf16.mxu0 %v2688_v16  ;;  %v3739_v1 = vand.u32 4294901760, %v3731_v61  ;;  %v4494_v15 = vand.u32 4294901760, %v3381_v58  ;;  %v4495_v16 = vand.u32 4294901760, %v4490_v14 }
  0x72   :  { %v1483_v59 = vand.u32 4294901760, %v1482_v11  ;;  %v415_v43 = vand.u32 4294901760, %v414_v51  ;;  %252 = vmatprep.mubr.f32.mxu0 %v4467_v21  ;;  %v3744_v4 = vsub.f32 %v4492_v9, %v4493_v3  ;;  %v421_v23 = vand.u32 4294901760, %v420_v0 }
  0x73   :  { %4491 = vst [vmem:[#allocation35_spill] sm:$0xff] %v3739_v1  ;;  %v3749_v11 = vsub.f32 %v3381_v58, %v4494_v15  ;;  %v432_v51 = vsub.f32 %v4490_v14, %v4495_v16  ;;  %v4386_v29 = vand.u32 4294901760, %v4496_v5  ;;  %v256_v40 = vsub.f32 %v3731_v61, %v3739_v1 }
  0x74   :  { %v2880_v60 = vpack.c.bf16 %v1483_v59, %v1476_v34  ;;  %v2690_v41 = vpack.c.bf16 %v415_v43, %v403_v20  ;;  %v4387_v9 = vand.u32 4294901760, %v3744_v4  ;;  %v4390_v34 = vand.u32 4294901760, %v3428_v12 }
  0x75   :  { %v4388_v3 = vand.u32 4294901760, %v3749_v11  ;;  %v433_v58 = vand.u32 4294901760, %v432_v51  ;;  %v426_v0 = vsub.f32 %v4496_v5, %v4386_v29  ;;  %v3763_v59 = vand.u32 4294901760, %v47_v24 }
  0x76   :  { %2881 = vmatprep.subr.bf16.mxu1 %v2880_v60  ;;  %2691 = vmatpush1.bf16.msra.mxu0 %v2690_v41  ;;  %v257_v20 = vand.u32 4294901760, %v256_v40  ;;  %v1489_v43 = vsub.f32 %v3744_v4, %v4387_v9  ;;  %v4389_v16 = vand.u32 4294901760, %v3432_v45  ;;  %v438_v29 = vsub.f32 %v3428_v12, %v4390_v34 }
  0x77   :  { %4497 = vst [vmem:[#allocation27_spill] sm:$0xff] %v3763_v59  ;;  %2883 = vmatpush3.bf16.msra.mxu1 %v2880_v60  ;;  %v1496_v15 = vsub.f32 %v3749_v11, %v4388_v3  ;;  %v2692_v51 = vpack.c.bf16 %v433_v58, %v421_v23  ;;  %v427_v1 = vand.u32 4294901760, %v426_v0  ;;  %v3776_v41 = vsub.f32 %v47_v24, %v3763_v59 }
  0x78   :  { %258 = vmatmul.mubr.f32.gmra.mrb[12].mxu0 %v257_v20  ;;  %v1490_v40 = vand.u32 4294901760, %v1489_v43  ;;  %v444_v9 = vsub.f32 %v3432_v45, %v4389_v16  ;;  %v4396_v3 = vand.u32 4294901760, %v3435_v39  ;;  %2413 = vmatprep.mubr.f32.mxu1 %v257_v20  ;;  %v439_v23 = vand.u32 4294901760, %v438_v29 }
  0x79   :  { %4498 = vst [vmem:[#allocation37_spill] sm:$0xff] %v3776_v41  ;;  %v1497_v60 = vand.u32 4294901760, %v1496_v15  ;;  %2693 = vmatprep.subr.bf16.mxu0 %v2692_v51  ;;  %262 = vmatprep.mubr.f32.mxu0 %v4467_v21  ;;  %v3784_v58 = vand.u32 4294901760, %v3776_v41  ;;  %v4500_v24 = vand.u32 4294901760, %v3396_v48  ;;  %v4501_v43 = vand.u32 4294901760, %v3406_v63 }
  0x7a   :  { %v445_v34 = vand.u32 4294901760, %v444_v9  ;;  %v456_v29 = vsub.f32 %v3435_v39, %v4396_v3  ;;  %v4395_v20 = vand.u32 4294901760, %v3443_v53  ;;  %v2694_v51 = vpack.c.bf16 %v439_v23, %v427_v1 }
  0x7b   :  { %4499 = vst [vmem:[#allocation65_spill] sm:$0xff] %v3784_v58  ;;  %v3789_v0 = vsub.f32 %v3396_v48, %v4500_v24  ;;  %v3794_v15 = vsub.f32 %v3406_v63, %v4501_v43  ;;  %v2884_v16 = vpack.c.bf16 %v1497_v60, %v1490_v40  ;;  %v266_v61 = vsub.f32 %v3776_v41, %v3784_v58 }
  0x7c   :  { %v457_v59 = vand.u32 4294901760, %v456_v29  ;;  %v450_v63 = vsub.f32 %v3443_v53, %v4395_v20  ;;  %v4398_v9 = vand.u32 4294901760, %v3459_v37  ;;  %2695 = vmatpush1.bf16.msra.mxu0 %v2694_v51  ;;  %v2700_v51 = vpack.c.bf16 %v3246_v18, %v3244_v17 }
  0x7d   :  { %4502 = vst [vmem:[#allocation66_spill] sm:$0xff] %v3794_v15  ;;  %v4397_v48 = vand.u32 4294901760, %v3789_v0  ;;  %v4399_v24 = vand.u32 4294901760, %v3794_v15  ;;  %2885 = vmatprep.subr.bf16.mxu1 %v2884_v16  ;;  %v267_v40 = vand.u32 4294901760, %v266_v61  ;;  %v4511_v41 = vand.u32 4294901760, %v3260_v26 }
  0x7e   :  { %2887 = vmatpush3.bf16.msra.mxu1 %v2884_v16  ;;  %v2696_v23 = vpack.c.bf16 %v457_v59, %v445_v34  ;;  %v451_v43 = vand.u32 4294901760, %v450_v63  ;;  %v462_v29 = vsub.f32 %v3459_v37, %v4398_v9  ;;  %v4504_v34 = vld [vmem:[#allocation43_spill] sm:$0xff]  ;;  %v4505_v9 = vld [vmem:[#allocation14_spill] sm:$0xff]  ;;  %v4512_v53 = vand.u32 4294901760, %v3265_v31 }
  0x7f   :  { %v1503_v1 = vsub.f32 %v3789_v0, %v4397_v48  ;;  %v1510_v60 = vsub.f32 %v3794_v15, %v4399_v24  ;;  %268 = vmatmul.mubr.f32.gmra.mrb[14].mxu0 %v267_v40  ;;  %2414 = vmatmul.mubr.f32.gmra.mrb[6].mxu1 %v267_v40  ;;  %v4503_v48 = vld [vmem:[#allocation42_spill] sm:$0xff]  ;;  %v2892_v59 = vpack.c.bf16 %v3464_v33, %v4504_v34  ;;  %v4510_v58 = vand.u32 4294901760, %v4505_v9 }
  0x80   :  { %2697 = vmatprep.subr.bf16.mxu0 %v2696_v23  ;;  %v463_v61 = vand.u32 4294901760, %v462_v29  ;;  %497 = vmatprep.mubr.f32.mxu0 %v4467_v21  ;;  %v2704_v40 = vpack.c.bf16 %v3276_v42, %v3265_v31  ;;  %v2900_v23 = vpack.c.bf16 %v3572_v62, %v3567_v25  ;;  %v4506_v29 = vand.u32 4294901760, %v3244_v17 }
  0x81   :  { %v1504_v20 = vand.u32 4294901760, %v1503_v1  ;;  %v1511_v3 = vand.u32 4294901760, %v1510_v60  ;;  %2448 = vmatprep.mubr.f32.mxu1 %v4503_v48  ;;  %v2702_v1 = vpack.c.bf16 %v3260_v26, %v4505_v9  ;;  %v2708_v60 = vpack.c.bf16 %v3301_v55, %v3299_v54 }
  0x82   :  { %v2698_v63 = vpack.c.bf16 %v463_v61, %v451_v43  ;;  %v2710_v43 = vpack.c.bf16 %v3323_v13, %v3314_v2  ;;  %v4507_v61 = vand.u32 4294901760, %v3246_v18  ;;  %v3853_v37 = vpack.c.bf16 %v4511_v41, %v4510_v58 }
  0x83   :  { %v2888_v16 = vpack.c.bf16 %v1511_v3, %v1504_v20  ;;  %v2896_v3 = vpack.c.bf16 %v3523_v8, %v3518_v6  ;;  %v2706_v20 = vpack.c.bf16 %v3291_v50, %v3289_v49  ;;  %v4513_v17 = vand.u32 4294901760, %v3276_v42 }
  0x84   :  { %2699 = vmatpush1.bf16.msra.mxu0 %v2698_v63  ;;  %v4508_v63 = vand.u32 4294901760, %v4504_v34  ;;  %v4514_v18 = vand.u32 4294901760, %v3518_v6  ;;  %v4516_v26 = vand.u32 4294901760, %v3289_v49  ;;  %v4517_v41 = vand.u32 4294901760, %v3291_v50 }
  0x85   :  { %2889 = vmatprep.subr.bf16.mxu1 %v2888_v16  ;;  %2701 = vmatprep.subr.bf16.mxu0 %v2700_v51  ;;  %v4509_v51 = vand.u32 4294901760, %v3464_v33  ;;  %v3859_v15 = vpack.c.bf16 %v4513_v17, %v4512_v53  ;;  %v4515_v33 = vand.u32 4294901760, %v3523_v8  ;;  %v4518_v31 = vand.u32 4294901760, %v3299_v54 }
  0x86   :  { %2891 = vmatpush3.bf16.msra.mxu1 %v2888_v16  ;;  %v3841_v16 = vpack.c.bf16 %v4507_v61, %v4506_v29  ;;  %v3873_v58 = vpack.c.bf16 %v4517_v41, %v4516_v26  ;;  %v4519_v42 = vand.u32 4294901760, %v3301_v55  ;;  %v4520_v6 = vand.u32 4294901760, %v3567_v25 }
  0x87   :  { %2893 = vmatprep.subr.bf16.mxu1 %v2892_v59  ;;  %v3847_v24 = vpack.c.bf16 %v4509_v51, %v4508_v63  ;;  %499 = vmatmul.mubr.f32.vlgmr.msra.gmra.mrb[0].mxu0 %v4503_v48  ;;  %v3867_v34 = vpack.c.bf16 %v4515_v33, %v4514_v18  ;;  %v4521_v8 = vand.u32 4294901760, %v3572_v62  ;;  %v4522_v49 = vand.u32 4294901760, %v3314_v2 }
  0x88   :  { %v3879_v53 = vpack.c.bf16 %v4519_v42, %v4518_v31  ;;  %2703 = vmatpush1.bf16.msra.mxu0 %v2702_v1  ;;  %v4523_v50 = vand.u32 4294901760, %v3323_v13  ;;  %v4524_v54 = vand.u32 4294901760, %v3327_v19  ;;  %v4525_v55 = vand.u32 4294901760, %v3330_v27  ;;  %503 = vmatprep.mubr.f32.mxu0 %v4467_v21 }
  0x89   :  { %2449 = vmatmul.mubr.f32.vlgmr.msra.gmra.mrb[8].mxu1 %v3483_v30  ;;  %v3885_v9 = vpack.c.bf16 %v4521_v8, %v4520_v6  ;;  %2705 = vmatprep.subr.bf16.mxu0 %v2704_v40  ;;  %v4526_v25 = vand.u32 4294901760, %v3605_v7  ;;  %v4527_v62 = vand.u32 4294901760, %v3614_v46  ;;  %v4528_v2 = vand.u32 4294901760, %v3338_v35  ;;  %v4532_v40 = vld [vmem:[#allocation51_spill] sm:$0xff] }
  0x8a   :  { %2895 = vmatpush3.bf16.msra.mxu1 %v2892_v59  ;;  %v3891_v29 = vpack.c.bf16 %v4523_v50, %v4522_v49  ;;  %v3897_v61 = vpack.c.bf16 %v4525_v55, %v4524_v54  ;;  %v4529_v13 = vand.u32 4294901760, %v3347_v57  ;;  %v4530_v63 = vand.u32 4294901760, %v3356_v56  ;;  %2451 = vmatprep.mubr.f32.mxu1 %v4532_v40  ;;  %v4539_v50 = vld [vmem:[#allocation54_spill] sm:$0xff] }
  0x8b   :  { %v3904_v59 = vpack.c.bf16 %v4527_v62, %v4526_v25  ;;  %v4531_v51 = vand.u32 4294901760, %v3358_v44  ;;  %2897 = vmatprep.subr.bf16.mxu1 %v2896_v3  ;;  %v4533_v18 = vand.u32 4294901760, %v3651_v52  ;;  %v4534_v33 = vand.u32 4294901760, %v3656_v22  ;;  %505 = vmatmul.mubr.f32.gmra.mrb[2].mxu0 %v3483_v30  ;;  %v4542_v62 = vld [vmem:[#allocation30_spill] sm:$0xff] }
  0x8c   :  { %v3910_v1 = vpack.c.bf16 %v4529_v13, %v4528_v2  ;;  %v4535_v41 = vand.u32 4294901760, %v3368_v32  ;;  %v4536_v31 = vand.u32 4294901760, %v3370_v10  ;;  %v4537_v6 = vand.u32 4294901760, %v3379_v38  ;;  %v4544_v13 = vld [vmem:[#allocation32_spill] sm:$0xff]  ;;  %2707 = vmatpush1.bf16.msra.mxu0 %v2706_v20  ;;  %509 = vmatprep.mubr.f32.mxu0 %v4467_v21 }
  0x8d   :  { %v3916_v17 = vpack.c.bf16 %v4531_v51, %v4530_v63  ;;  %v3923_v26 = vpack.c.bf16 %v4534_v33, %v4533_v18  ;;  %v4538_v8 = vand.u32 4294901760, %v3386_v36  ;;  %2452 = vmatmul.mubr.f32.gmra.mrb[10].mxu1 %v4539_v50  ;;  %v4540_v54 = vand.u32 4294901760, %v3698_v47  ;;  %v4547_v18 = vld [vmem:[#allocation34_spill] sm:$0xff]  ;;  %2709 = vmatprep.subr.bf16.mxu0 %v2708_v60  ;;  %v4566_v60 = vld [vmem:[#allocation57_spill] sm:$0xff] }
  0x8e   :  { %v3929_v42 = vpack.c.bf16 %v4536_v31, %v4535_v41  ;;  %v4541_v55 = vand.u32 4294901760, %v3703_v28  ;;  %v4543_v2 = vand.u32 4294901760, %v4542_v62  ;;  %v4545_v63 = vand.u32 4294901760, %v4544_v13  ;;  %2899 = vmatpush3.bf16.msra.mxu1 %v2896_v3  ;;  %2454 = vmatprep.mubr.f32.mxu1 %v4566_v60 }
  0x8f   :  { %v3935_v49 = vpack.c.bf16 %v4538_v8, %v4537_v6  ;;  %v4548_v33 = vand.u32 4294901760, %v4547_v18  ;;  %v4549_v41 = vand.u32 4294901760, %v4490_v14  ;;  %v4551_v6 = vand.u32 4294901760, %v3744_v4  ;;  %2901 = vmatprep.subr.bf16.mxu1 %v2900_v23  ;;  %511 = vmatmul.mubr.f32.gmra.mrb[4].mxu0 %v4532_v40 }
  0x90   :  { %v3943_v25 = vpack.c.bf16 %v4541_v55, %v4540_v54  ;;  %v3949_v51 = vpack.c.bf16 %v4545_v63, %v4543_v2  ;;  %v4552_v8 = vand.u32 4294901760, %v3749_v11  ;;  %v4554_v55 = vand.u32 4294901760, %v4496_v5  ;;  %2711 = vmatpush1.bf16.msra.mxu0 %v2710_v43  ;;  %515 = vmatprep.mubr.f32.mxu0 %v4467_v21  ;;  %v4581_v43 = vld [vmem:[#allocation19_spill] sm:$0xff] }
  0x91   :  { %v3955_v31 = vpack.c.bf16 %v4549_v41, %v4548_v33  ;;  %v4555_v30 = vand.u32 4294901760, %v3428_v12  ;;  %v4557_v63 = vand.u32 4294901760, %v3432_v45  ;;  %v2712_v3 = vpack.c.bf16 %v3330_v27, %v3327_v19  ;;  %v4560_v41 = vld [vmem:[#allocation66_spill] sm:$0xff]  ;;  %v4567_v19 = vld [vmem:[#allocation60_spill] sm:$0xff] }
  0x92   :  { %4546 = vst [vmem:[#allocation42_spill] sm:$0xff] %v3949_v51  ;;  %v3961_v54 = vpack.c.bf16 %v4552_v8, %v4551_v6  ;;  %v4558_v51 = vand.u32 4294901760, %v3435_v39  ;;  %v4559_v20 = vand.u32 4294901760, %v3789_v0  ;;  %v4561_v6 = vand.u32 4294901760, %v4560_v41  ;;  %2455 = vmatmul.mubr.f32.gmra.mrb[12].mxu1 %v4567_v19 }
  0x93   :  { %4550 = vst [vmem:[#allocation43_spill] sm:$0xff] %v3955_v31  ;;  %v3967_v2 = vpack.c.bf16 %v4555_v30, %v4554_v55  ;;  %v4562_v30 = vld [vmem:[#allocation41_spill] sm:$0xff]  ;;  %2903 = vmatpush3.bf16.msra.mxu1 %v2900_v23  ;;  %v2714_v27 = vpack.c.bf16 %v3347_v57, %v3338_v35  ;;  %2713 = vmatprep.subr.bf16.mxu0 %v2712_v3  ;;  %v4570_v57 = vld [vmem:[#allocation46_spill] sm:$0xff] }
  0x94   :  { %4553 = vst [vmem:[#allocation14_spill] sm:$0xff] %v3961_v54  ;;  %v3973_v33 = vpack.c.bf16 %v4558_v51, %v4557_v63  ;;  %v3982_v8 = vpack.c.bf16 %v4561_v6, %v4559_v20  ;;  %v4563_v55 = vand.u32 4294901760, %v4562_v30  ;;  %v2904_v51 = vpack.c.bf16 %v3614_v46, %v3605_v7  ;;  %v4568_v46 = vld [vmem:[#allocation63_spill] sm:$0xff]  ;;  %517 = vmatmul.mubr.f32.gmra.mrb[6].mxu0 %v4539_v50  ;;  %v4580_v23 = vld [vmem:[#allocation18_spill] sm:$0xff]  ;;  %v4587_v20 = vld [vmem:[#allocation64_spill] sm:$0xff] }
  0x95   :  { %4556 = vst [vmem:[#allocation51_spill] sm:$0xff] %v3967_v2  ;;  %v4564_v2 = vld [vmem:[#allocation45_spill] sm:$0xff]  ;;  %v2908_v7 = vpack.c.bf16 %v3656_v22, %v3651_v52  ;;  %2457 = vmatprep.mubr.f32.mxu1 %v4568_v46  ;;  %v4569_v63 = vld [vmem:[#allocation27_spill] sm:$0xff]  ;;  %2715 = vmatpush1.bf16.msra.mxu0 %v2714_v27  ;;  %v2718_v35 = vpack.c.bf16 %v3370_v10, %v3368_v32  ;;  %v4586_v3 = vld [vmem:[#allocation22_spill] sm:$0xff] }
  0x96   :  { %v4565_v54 = vand.u32 4294901760, %v4564_v2  ;;  %2905 = vmatprep.subr.bf16.mxu1 %v2904_v51  ;;  %2458 = vmatmul.mubr.f32.gmra.mrb[6].mxu1 %v4569_v63  ;;  %v2722_v52 = vpack.c.bf16 %v4544_v13, %v4542_v62  ;;  %v2724_v10 = vpack.c.bf16 %v4490_v14, %v4547_v18  ;;  %v2916_v32 = vpack.c.bf16 %v3749_v11, %v3744_v4  ;;  %v4576_v4 = vld [vmem:[#allocation16_spill] sm:$0xff]  ;;  %v4578_v11 = vld [vmem:[#allocation55_spill] sm:$0xff]  ;;  %v4582_v62 = vld [vmem:[#allocation58_spill] sm:$0xff] }
  0x97   :  { %2907 = vmatpush3.bf16.msra.mxu1 %v2904_v51  ;;  %521 = vmatprep.mubr.f32.mxu0 %v4467_v21  ;;  %v2920_v14 = vpack.c.bf16 %v4560_v41, %v3789_v0  ;;  %v2730_v22 = vpack.c.bf16 %v4564_v2, %v4562_v30  ;;  %v4579_v0 = vld [vmem:[#allocation17_spill] sm:$0xff]  ;;  %v4584_v18 = vld [vmem:[#allocation20_spill] sm:$0xff]  ;;  %v4589_v6 = vld [vmem:[#allocation23_spill] sm:$0xff] }
  0x98   :  { %v3988_v31 = vpack.c.bf16 %v4565_v54, %v4563_v55  ;;  %v2716_v54 = vpack.c.bf16 %v3358_v44, %v3356_v56  ;;  %v2720_v44 = vpack.c.bf16 %v3386_v36, %v3379_v38  ;;  %2909 = vmatprep.subr.bf16.mxu1 %v2908_v7  ;;  %v2912_v56 = vpack.c.bf16 %v3703_v28, %v3698_v47  ;;  %v4574_v47 = vld [vmem:[#allocation13_spill] sm:$0xff]  ;;  %v4575_v28 = vld [vmem:[#allocation15_spill] sm:$0xff]  ;;  %v4590_v30 = vld [vmem:[#allocation24_spill] sm:$0xff] }
  0x99   :  { %2492 = vmatprep.mubr.f32.mxu1 %v4570_v57  ;;  %523 = vmatmul.mubr.f32.gmra.mrb[8].mxu0 %v4566_v60  ;;  %v2726_v38 = vpack.c.bf16 %v3428_v12, %v4496_v5  ;;  %v2728_v36 = vpack.c.bf16 %v3435_v39, %v3432_v45  ;;  %v4571_v39 = vld [vmem:[#allocation11_spill] sm:$0xff]  ;;  %v4572_v45 = vld [vmem:[#allocation12_spill] sm:$0xff]  ;;  %v4573_v12 = vld [vmem:[#allocation49_spill] sm:$0xff] }
  0x9a   :  { %2717 = vmatprep.subr.bf16.mxu0 %v2716_v54  ;;  %527 = vmatprep.mubr.f32.mxu0 %v4467_v21  ;;  %v4577_v5 = vld [vmem:[#allocation52_spill] sm:$0xff]  ;;  %v4583_v13 = vld [vmem:[#allocation61_spill] sm:$0xff]  ;;  %v4593_v27 = vld [vmem:[#allocation26_spill] sm:$0xff] }
  0x9b   :  { %2719 = vmatpush1.bf16.msra.mxu0 %v2718_v35  ;;  %2911 = vmatpush3.bf16.msra.mxu1 %v2908_v7  ;;  %v4585_v2 = vld [vmem:[#allocation21_spill] sm:$0xff]  ;;  %v4592_v51 = vld [vmem:[#allocation48_spill] sm:$0xff]  ;;  %v4596_v35 = vld [vmem:[#allocation31_spill] sm:$0xff] }
  0x9c   :  { %2721 = vmatprep.subr.bf16.mxu0 %v2720_v44  ;;  %2913 = vmatprep.subr.bf16.mxu1 %v2912_v56  ;;  %v4588_v41 = vld [vmem:[#allocation37_spill] sm:$0xff]  ;;  %v4594_v54 = vld [vmem:[#allocation28_spill] sm:$0xff] }
  0x9d   :  { %529 = vmatmul.mubr.f32.gmra.mrb[10].mxu0 %v4567_v19  ;;  %v4591_v55 = vld [vmem:[#allocation25_spill] sm:$0xff] }
  0x9e   :  { %533 = vmatprep.mubr.f32.mxu0 %v4467_v21  ;;  %v4595_v7 = vld [vmem:[#allocation29_spill] sm:$0xff] }
  0x9f   :  { %2723 = vmatpush1.bf16.msra.mxu0 %v2722_v52  ;;  %2915 = vmatpush3.bf16.msra.mxu1 %v2912_v56  ;;  %v4597_v44 = vld [vmem:[#allocation33_spill] sm:$0xff]  ;;  %v4598_v56 = vld [vmem:[#allocation36_spill] sm:$0xff]  ;;  %v4600_v52 = vld [vmem:[#allocation39_spill] sm:$0xff] }
  0xa0   :  { %2725 = vmatprep.subr.bf16.mxu0 %v2724_v10  ;;  %2917 = vmatprep.subr.bf16.mxu1 %v2916_v32  ;;  %v4601_v10 = vld [vmem:[#allocation40_spill] sm:$0xff] }
  0xa1   :  { %535 = vmatmul.mubr.f32.gmra.mrb[12].mxu0 %v4568_v46 }
  0xa2   :  { %539 = vmatprep.mubr.f32.mxu0 %v4467_v21 }
  0xa3   :  { %2727 = vmatpush1.bf16.msra.mxu0 %v2726_v38  ;;  %2919 = vmatpush3.bf16.msra.mxu1 %v2916_v32  ;;  %v4602_v32 = vld [vmem:[#allocation44_spill] sm:$0xff]  ;;  %v4603_v38 = vld [vmem:[#allocation50_spill] sm:$0xff] }
  0xa4   :  { %2729 = vmatprep.subr.bf16.mxu0 %v2728_v36  ;;  %2921 = vmatprep.subr.bf16.mxu1 %v2920_v14  ;;  %v4604_v36 = vld [vmem:[#allocation53_spill] sm:$0xff] }
  0xa5   :  { %541 = vmatmul.mubr.f32.gmra.mrb[14].mxu0 %v4569_v63 }
  0xa6   :  { %674 = vmatprep.mubr.f32.mxu0 %v4467_v21 }
  0xa7   :  { %2731 = vmatpush1.bf16.msra.mxu0 %v2730_v22  ;;  %2923 = vmatpush3.bf16.msra.mxu1 %v2920_v14 }
  0xa8   :  { %2733 = vmatprep.subr.bf16.mxu0 %v4571_v39  ;;  %2925 = vmatprep.subr.bf16.mxu1 %v4572_v45 }
  0xaa   :  { %677 = vmatmul.mubr.f32.vlgmr.msra.gmra.mrb[0].mxu0 %v4570_v57  ;;  %2493 = vmatmul.mubr.f32.vlgmr.msra.gmra.mrb[14].mxu1 %v4573_v12  ;;  %v4599_v57 = vld [vmem:[#allocation38_spill] sm:$0xff] }
  0xab   :  { %2735 = vmatpush1.bf16.msra.mxu0 %v4574_v47  ;;  %2927 = vmatpush3.bf16.msra.mxu1 %v4572_v45 }
  0xac   :  { %681 = vmatprep.mubr.f32.mxu0 %v4467_v21  ;;  %2737 = vmatprep.subr.bf16.mxu0 %v4575_v28 }
  0xad   :  { %2929 = vmatprep.subr.bf16.mxu1 %v4576_v4  ;;  %2495 = vmatprep.mubr.f32.mxu1 %v4577_v5 }
  0xae   :  { %684 = vmatmul.mubr.f32.gmra.mrb[2].mxu0 %v4573_v12  ;;  %2496 = vmatmul.mubr.f32.gmra.mrb[16].mxu1 %v4578_v11 }
  0xaf   :  { %2739 = vmatpush1.bf16.msra.mxu0 %v4579_v0  ;;  %2931 = vmatpush3.bf16.msra.mxu1 %v4576_v4 }
  0xb0   :  { %688 = vmatprep.mubr.f32.mxu0 %v4467_v21  ;;  %2741 = vmatprep.subr.bf16.mxu0 %v4580_v23 }
  0xb1   :  { %2933 = vmatprep.subr.bf16.mxu1 %v4581_v43  ;;  %2498 = vmatprep.mubr.f32.mxu1 %v4582_v62 }
  0xb2   :  { %691 = vmatmul.mubr.f32.gmra.mrb[4].mxu0 %v4577_v5  ;;  %2499 = vmatmul.mubr.f32.gmra.mrb[18].mxu1 %v4583_v13 }
  0xb3   :  { %2743 = vmatpush1.bf16.msra.mxu0 %v4584_v18  ;;  %2935 = vmatpush3.bf16.msra.mxu1 %v4581_v43 }
  0xb4   :  { %695 = vmatprep.mubr.f32.mxu0 %v4467_v21  ;;  %2745 = vmatprep.subr.bf16.mxu0 %v4585_v2 }
  0xb5   :  { %2937 = vmatprep.subr.bf16.mxu1 %v4586_v3  ;;  %2501 = vmatprep.mubr.f32.mxu1 %v4587_v20 }
  0xb6   :  { %698 = vmatmul.mubr.f32.gmra.mrb[6].mxu0 %v4578_v11  ;;  %2502 = vmatmul.mubr.f32.gmra.mrb[6].mxu1 %v4588_v41 }
  0xb7   :  { %2747 = vmatpush1.bf16.msra.mxu0 %v4589_v6  ;;  %2939 = vmatpush3.bf16.msra.mxu1 %v4586_v3 }
  0xb8   :  { %702 = vmatprep.mubr.f32.mxu0 %v4467_v21  ;;  %2749 = vmatprep.subr.bf16.mxu0 %v4590_v30 }
  0xb9   :  { %2941 = vmatprep.subr.bf16.mxu1 %v4591_v55  ;;  %2536 = vmatprep.mubr.f32.mxu1 %v4592_v51 }
  0xba   :  { %705 = vmatmul.mubr.f32.gmra.mrb[8].mxu0 %v4582_v62 }
  0xbb   :  { %2751 = vmatpush1.bf16.msra.mxu0 %v4593_v27  ;;  %2943 = vmatpush3.bf16.msra.mxu1 %v4591_v55 }
  0xbc   :  { %709 = vmatprep.mubr.f32.mxu0 %v4467_v21  ;;  %2753 = vmatprep.subr.bf16.mxu0 %v4594_v54 }
  0xbd   :  { %2945 = vmatprep.subr.bf16.mxu1 %v4595_v7 }
  0xbe   :  { %712 = vmatmul.mubr.f32.gmra.mrb[10].mxu0 %v4583_v13 }
  0xbf   :  { %2755 = vmatpush1.bf16.msra.mxu0 %v4596_v35  ;;  %2947 = vmatpush3.bf16.msra.mxu1 %v4595_v7 }
  0xc0   :  { %716 = vmatprep.mubr.f32.mxu0 %v4467_v21  ;;  %2757 = vmatprep.subr.bf16.mxu0 %v4597_v44 }
  0xc1   :  { %2949 = vmatprep.subr.bf16.mxu1 %v4598_v56 }
  0xc2   :  { %719 = vmatmul.mubr.f32.gmra.mrb[12].mxu0 %v4587_v20 }
  0xc3   :  { %2759 = vmatpush1.bf16.msra.mxu0 %v4599_v57  ;;  %2951 = vmatpush3.bf16.msra.mxu1 %v4598_v56 }
  0xc4   :  { %723 = vmatprep.mubr.f32.mxu0 %v4467_v21  ;;  %2761 = vmatprep.subr.bf16.mxu0 %v4600_v52 }
  0xc5   :  { %2953 = vmatprep.subr.bf16.mxu1 %v4601_v10 }
  0xc6   :  { %726 = vmatmul.mubr.f32.gmra.mrb[14].mxu0 %v4588_v41 }
  0xc7   :  { %2763 = vmatpush1.bf16.msra.mxu0 %v4602_v32  ;;  %2955 = vmatpush3.bf16.msra.mxu1 %v4601_v10 }
  0xc8   :  { %827 = vmatprep.mubr.f32.mxu0 %v4467_v21  ;;  %2765 = vmatprep.subr.bf16.mxu0 %v3841_v16  ;;  %v4605_v16 = vld [vmem:[#allocation56_spill] sm:$0xff] }
  0xc9   :  { %2957 = vmatprep.subr.bf16.mxu1 %v3847_v24 }
  0xca   :  { %831 = vmatmul.mubr.f32.vlgmr.msra.gmra.mrb[0].mxu0 %v4592_v51  ;;  %2537 = vmatmul.mubr.f32.vlgmr.msra.gmra.mrb[20].mxu1 %v4603_v38 }
  0xcb   :  { %2767 = vmatpush1.bf16.msra.mxu0 %v3853_v37  ;;  %2959 = vmatpush3.bf16.msra.mxu1 %v3847_v24  ;;  %v4606_v37 = vld [vmem:[#allocation59_spill] sm:$0xff] }
  0xcc   :  { %835 = vmatprep.mubr.f32.mxu0 %v4467_v21  ;;  %2769 = vmatprep.subr.bf16.mxu0 %v3859_v15  ;;  %v4607_v15 = vld [vmem:[#allocation62_spill] sm:$0xff]  ;;  %v4608_v24 = vld [vmem:[#allocation35_spill] sm:$0xff] }
  0xcd   :  { %2961 = vmatprep.subr.bf16.mxu1 %v3867_v34  ;;  %2539 = vmatprep.mubr.f32.mxu1 %v4604_v36 }
  0xce   :  { %839 = vmatmul.mubr.f32.gmra.mrb[2].mxu0 %v4603_v38  ;;  %2540 = vmatmul.mubr.f32.gmra.mrb[22].mxu1 %v4605_v16 }
  0xcf   :  { %2771 = vmatpush1.bf16.msra.mxu0 %v3873_v58  ;;  %2963 = vmatpush3.bf16.msra.mxu1 %v3867_v34  ;;  %v4609_v34 = vld [vmem:[#allocation65_spill] sm:$0xff]  ;;  %v4610_v58 = vld [vmem:[#allocation42_spill] sm:$0xff] }
  0xd0   :  { %843 = vmatprep.mubr.f32.mxu0 %v4467_v21  ;;  %2773 = vmatprep.subr.bf16.mxu0 %v3879_v53  ;;  %v4611_v53 = vld [vmem:[#allocation43_spill] sm:$0xff] }
  0xd1   :  { %2965 = vmatprep.subr.bf16.mxu1 %v3885_v9  ;;  %2542 = vmatprep.mubr.f32.mxu1 %v4606_v37 }
  0xd2   :  { %847 = vmatmul.mubr.f32.gmra.mrb[4].mxu0 %v4604_v36  ;;  %2543 = vmatmul.mubr.f32.gmra.mrb[24].mxu1 %v4607_v15 }
  0xd3   :  { %2775 = vmatpush1.bf16.msra.mxu0 %v3891_v29  ;;  %2967 = vmatpush3.bf16.msra.mxu1 %v3885_v9  ;;  %v4612_v9 = vld [vmem:[#allocation14_spill] sm:$0xff]  ;;  %v4613_v29 = vld [vmem:[#allocation51_spill] sm:$0xff] }
  0xd4   :  { %851 = vmatprep.mubr.f32.mxu0 %v4467_v21  ;;  %2777 = vmatprep.subr.bf16.mxu0 %v3897_v61  ;;  %v4614_v61 = vld [vmem:[#allocation47_spill] sm:$0xff] }
  0xd5   :  { %2969 = vmatprep.subr.bf16.mxu1 %v3904_v59  ;;  %2545 = vmatprep.mubr.f32.mxu1 %v4608_v24 }
  0xd6   :  { %855 = vmatmul.mubr.f32.gmra.mrb[6].mxu0 %v4605_v16  ;;  %2546 = vmatmul.mubr.f32.gmra.mrb[6].mxu1 %v4609_v34 }
  0xd7   :  { %2779 = vmatpush1.bf16.msra.mxu0 %v3910_v1  ;;  %2971 = vmatpush3.bf16.msra.mxu1 %v3904_v59 }
  0xd8   :  { %859 = vmatprep.mubr.f32.mxu0 %v4467_v21  ;;  %2781 = vmatprep.subr.bf16.mxu0 %v3916_v17 }
  0xd9   :  { %2973 = vmatprep.subr.bf16.mxu1 %v3923_v26  ;;  %2580 = vmatprep.mubr.f32.mxu1 %v4503_v48 }
  0xda   :  { %863 = vmatmul.mubr.f32.gmra.mrb[8].mxu0 %v4606_v37 }
  0xdb   :  { %2783 = vmatpush1.bf16.msra.mxu0 %v3929_v42  ;;  %2975 = vmatpush3.bf16.msra.mxu1 %v3923_v26 }
  0xdc   :  { %867 = vmatprep.mubr.f32.mxu0 %v4467_v21  ;;  %2785 = vmatprep.subr.bf16.mxu0 %v3935_v49 }
  0xdd   :  { %2977 = vmatprep.subr.bf16.mxu1 %v3943_v25 }
  0xde   :  { %871 = vmatmul.mubr.f32.gmra.mrb[10].mxu0 %v4607_v15 }
  0xdf   :  { %2787 = vmatpush1.bf16.msra.mxu0 %v4610_v58  ;;  %2979 = vmatpush3.bf16.msra.mxu1 %v3943_v25 }
  0xe0   :  { %875 = vmatprep.mubr.f32.mxu0 %v4467_v21  ;;  %2789 = vmatprep.subr.bf16.mxu0 %v4611_v53 }
  0xe1   :  { %2981 = vmatprep.subr.bf16.mxu1 %v4612_v9 }
  0xe2   :  { %879 = vmatmul.mubr.f32.gmra.mrb[12].mxu0 %v4608_v24 }
  0xe3   :  { %2791 = vmatpush1.bf16.msra.mxu0 %v4613_v29  ;;  %2983 = vmatpush3.bf16.msra.mxu1 %v4612_v9 }
  0xe4   :  { %883 = vmatprep.mubr.f32.mxu0 %v4467_v21  ;;  %2793 = vmatprep.subr.bf16.mxu0 %v3973_v33 }
  0xe5   :  { %2985 = vmatprep.subr.bf16.mxu1 %v3982_v8 }
  0xe6   :  { %887 = vmatmul.mubr.f32.gmra.mrb[14].mxu0 %v4609_v34 }
  0xe7   :  { %2795 = vmatpush1.bf16.msra.mxu0 %v3988_v31  ;;  %2987 = vmatpush3.bf16.msra.mxu1 %v3982_v8 }
  0xe8   :  { %1052 = vmatprep.mubr.f32.mxu0 %v4467_v21  ;;  %2797 = vmatprep.subr.bf16.mxu0 %v4571_v39 }
  0xe9   :  { %2989 = vmatprep.subr.bf16.mxu1 %v4572_v45 }
  0xea   :  { %1054 = vmatmul.mubr.f32.vlgmr.msra.gmra.mrb[0].mxu0 %v4503_v48  ;;  %2581 = vmatmul.mubr.f32.vlgmr.msra.gmra.mrb[26].mxu1 %v4614_v61 }
  0xeb   :  { %2799 = vmatpush1.bf16.msra.mxu0 %v4574_v47  ;;  %2991 = vmatpush3.bf16.msra.mxu1 %v4572_v45 }
  0xec   :  { %1058 = vmatprep.mubr.f32.mxu0 %v4467_v21  ;;  %2801 = vmatprep.subr.bf16.mxu0 %v4575_v28 }
  0xed   :  { %2993 = vmatprep.subr.bf16.mxu1 %v4576_v4  ;;  %2583 = vmatprep.mubr.f32.mxu1 %v4532_v40 }
  0xee   :  { %1060 = vmatmul.mubr.f32.gmra.mrb[2].mxu0 %v4614_v61  ;;  %2584 = vmatmul.mubr.f32.gmra.mrb[28].mxu1 %v4539_v50 }
  0xef   :  { %2803 = vmatpush1.bf16.msra.mxu0 %v4579_v0  ;;  %2995 = vmatpush3.bf16.msra.mxu1 %v4576_v4 }
  0xf0   :  { %1064 = vmatprep.mubr.f32.mxu0 %v4467_v21  ;;  %2805 = vmatprep.subr.bf16.mxu0 %v4580_v23 }
  0xf1   :  { %2997 = vmatprep.subr.bf16.mxu1 %v4581_v43  ;;  %2586 = vmatprep.mubr.f32.mxu1 %v4566_v60 }
  0xf2   :  { %1066 = vmatmul.mubr.f32.gmra.mrb[4].mxu0 %v4532_v40  ;;  %2587 = vmatmul.mubr.f32.gmra.mrb[30].mxu1 %v4567_v19 }
  0xf3   :  { %2807 = vmatpush1.bf16.msra.mxu0 %v4584_v18  ;;  %2999 = vmatpush3.bf16.msra.mxu1 %v4581_v43 }
  0xf4   :  { %1070 = vmatprep.mubr.f32.mxu0 %v4467_v21  ;;  %2809 = vmatprep.subr.bf16.mxu0 %v4585_v2 }
  0xf5   :  { %3001 = vmatprep.subr.bf16.mxu1 %v4586_v3  ;;  %2589 = vmatprep.mubr.f32.mxu1 %v4568_v46 }
  0xf6   :  { %1072 = vmatmul.mubr.f32.gmra.mrb[6].mxu0 %v4539_v50  ;;  %2590 = vmatmul.mubr.f32.gmra.mrb[6].mxu1 %v4569_v63 }
  0xf7   :  { %2811 = vmatpush1.bf16.msra.mxu0 %v4589_v6  ;;  %3003 = vmatpush3.bf16.msra.mxu1 %v4586_v3 }
  0xf8   :  { %1076 = vmatprep.mubr.f32.mxu0 %v4467_v21  ;;  %2813 = vmatprep.subr.bf16.mxu0 %v4590_v30 }
  0xf9   :  { %3005 = vmatprep.subr.bf16.mxu1 %v4591_v55  ;;  %2624 = vmatprep.mubr.f32.mxu1 %v4503_v48 }
  0xfa   :  { %1078 = vmatmul.mubr.f32.gmra.mrb[8].mxu0 %v4566_v60 }
  0xfb   :  { %2815 = vmatpush1.bf16.msra.mxu0 %v4593_v27  ;;  %3007 = vmatpush3.bf16.msra.mxu1 %v4591_v55 }
  0xfc   :  { %1082 = vmatprep.mubr.f32.mxu0 %v4467_v21  ;;  %2817 = vmatprep.subr.bf16.mxu0 %v4594_v54 }
  0xfd   :  { %3009 = vmatprep.subr.bf16.mxu1 %v4595_v7 }
  0xfe   :  { %1084 = vmatmul.mubr.f32.gmra.mrb[10].mxu0 %v4567_v19 }
  0xff   :  { %2819 = vmatpush1.bf16.msra.mxu0 %v4596_v35  ;;  %3011 = vmatpush3.bf16.msra.mxu1 %v4595_v7 }
 0x100   :  { %1088 = vmatprep.mubr.f32.mxu0 %v4467_v21  ;;  %2821 = vmatprep.subr.bf16.mxu0 %v4597_v44 }
 0x101   :  { %3013 = vmatprep.subr.bf16.mxu1 %v4598_v56 }
 0x102   :  { %1090 = vmatmul.mubr.f32.gmra.mrb[12].mxu0 %v4568_v46 }
 0x103   :  { %2823 = vmatpush1.bf16.msra.mxu0 %v4599_v57  ;;  %3015 = vmatpush3.bf16.msra.mxu1 %v4598_v56 }
 0x104   :  { %1094 = vmatprep.mubr.f32.mxu0 %v4467_v21  ;;  %2825 = vmatprep.subr.bf16.mxu0 %v4600_v52 }
 0x105   :  { %3017 = vmatprep.subr.bf16.mxu1 %v4601_v10 }
 0x106   :  { %1096 = vmatmul.mubr.f32.gmra.mrb[14].mxu0 %v4569_v63 }
 0x107   :  { %2827 = vmatpush1.bf16.msra.mxu0 %v4602_v32  ;;  %3019 = vmatpush3.bf16.msra.mxu1 %v4601_v10 }
 0x108   :  { %1197 = vmatprep.mubr.f32.mxu0 %v4467_v21 }
 0x10a   :  { %1199 = vmatmul.mubr.f32.vlgmr.msra.gmra.mrb[0].mxu0 %v4503_v48  ;;  %2625 = vmatmul.mubr.f32.vlgmr.msra.gmra.mrb[32].mxu1 %v4614_v61 }
 0x10b   :  { %1203 = vmatprep.mubr.f32.mxu0 %v4467_v21  ;;  %2627 = vmatprep.mubr.f32.mxu1 %v4532_v40 }
 0x10e   :  { %1205 = vmatmul.mubr.f32.gmra.mrb[2].mxu0 %v4614_v61  ;;  %2628 = vmatmul.mubr.f32.gmra.mrb[34].mxu1 %v4539_v50 }
 0x10f   :  { %1209 = vmatprep.mubr.f32.mxu0 %v4467_v21  ;;  %2630 = vmatprep.mubr.f32.mxu1 %v4566_v60 }
 0x112   :  { %1211 = vmatmul.mubr.f32.gmra.mrb[4].mxu0 %v4532_v40  ;;  %2631 = vmatmul.mubr.f32.gmra.mrb[36].mxu1 %v4567_v19 }
 0x113   :  { %1215 = vmatprep.mubr.f32.mxu0 %v4467_v21  ;;  %2633 = vmatprep.mubr.f32.mxu1 %v4568_v46 }
 0x116   :  { %1217 = vmatmul.mubr.f32.gmra.mrb[6].mxu0 %v4539_v50  ;;  %2634 = vmatmul.mubr.f32.gmra.mrb[6].mxu1 %v4569_v63 }
 0x117   :  { %1221 = vmatprep.mubr.f32.mxu0 %v4467_v21 }
 0x11a   :  { %1223 = vmatmul.mubr.f32.gmra.mrb[8].mxu0 %v4566_v60 }
 0x11b   :  { %1227 = vmatprep.mubr.f32.mxu0 %v4467_v21 }
 0x11e   :  { %1229 = vmatmul.mubr.f32.gmra.mrb[10].mxu0 %v4567_v19 }
 0x11f   :  { %1233 = vmatprep.mubr.f32.mxu0 %v4467_v21 }
 0x122   :  { %1235 = vmatmul.mubr.f32.gmra.mrb[12].mxu0 %v4568_v46 }
 0x123   :  { %1239 = vmatprep.mubr.f32.mxu0 %v4467_v21  ;;  %v2406_v48 = vpop.f32.mrb[0].mxu1 }
 0x124   :  { %v1333_v59 = vpop.f32.mrb[1].mxu1 }
 0x126   :  { %1241 = vmatmul.mubr.f32.gmra.mrb[14].mxu0 %v4569_v63 }
 0x136   :  { %v2409_v1 = vpop.f32.mrb[2].mxu1 }
 0x137   :  { %v1351_v17 = vpop.f32.mrb[3].mxu1 }
 0x144   :  { %v2412_v40 = vpop.f32.mrb[4].mxu1 }
 0x145   :  { %v1369_v26 = vpop.f32.mrb[5].mxu1 }
 0x15c   :  { %v2450_v42 = vpop.f32.mrb[8].mxu1 }
 0x15d   :  { %v1548_v49 = vpop.f32.mrb[9].mxu1 }
 0x160   :  { %v2453_v50 = vpop.f32.mrb[10].mxu1 }
 0x161   :  { %v1558_v25 = vpop.f32.mrb[11].mxu1 }
 0x165   :  { %v2456_v31 = vpop.f32.mrb[12].mxu1 }
 0x166   :  { %v1568_v33 = vpop.f32.mrb[13].mxu1 }
 0x17d   :  { %v2494_v8 = vpop.f32.mrb[14].mxu1 }
 0x17e   :  { %v1688_v60 = vpop.f32.mrb[15].mxu1 }
 0x181   :  { %v2497_v19 = vpop.f32.mrb[16].mxu1 }
 0x182   :  { %v1700_v46 = vpop.f32.mrb[17].mxu1 }
 0x185   :  { %v2500_v14 = vpop.f32.mrb[18].mxu1 }
 0x186   :  { %v1712_v21 = vpop.f32.mrb[19].mxu1 }
 0x19d   :  { %v2538_v22 = vpop.f32.mrb[20].mxu1 }
 0x19e   :  { %v1820_v63 = vpop.f32.mrb[21].mxu1 }
 0x1a1   :  { %v2541_v39 = vpop.f32.mrb[22].mxu1 }
 0x1a2   :  { %v1834_v45 = vpop.f32.mrb[23].mxu1 }
 0x1a5   :  { %v2544_v12 = vpop.f32.mrb[24].mxu1 }
 0x1a6   :  { %v1848_v47 = vpop.f32.mrb[25].mxu1 }
 0x1bd   :  { %v2582_v28 = vpop.f32.mrb[26].mxu1 }
 0x1be   :  { %v1989_v4 = vpop.f32.mrb[27].mxu1 }
 0x1c1   :  { %v2585_v5 = vpop.f32.mrb[28].mxu1 }
 0x1c2   :  { %v1999_v11 = vpop.f32.mrb[29].mxu1 }
 0x1c5   :  { %v2588_v0 = vpop.f32.mrb[30].mxu1 }
 0x1c6   :  { %v2009_v23 = vpop.f32.mrb[31].mxu1 }
 0x1dd   :  { %v1200_v43 = vpop.f32.mrb[0].mxu0  ;;  %v2626_v62 = vpop.f32.mrb[32].mxu1 }
 0x1de   :  { %v1202_v13 = vpop.f32.mrb[1].mxu0  ;;  %v2112_v18 = vpop.f32.mrb[33].mxu1  ;;  %v2157_v20 = vmul.f32 %v1200_v43, %v1200_v43 }
 0x1e1   :  { %v1206_v2 = vpop.f32.mrb[2].mxu0  ;;  %v2629_v3 = vpop.f32.mrb[34].mxu1 }
 0x1e2   :  { %v2158_v41 = vmul.f32 %v1206_v2, %v1206_v2  ;;  %v1208_v6 = vpop.f32.mrb[3].mxu0  ;;  %v2122_v30 = vpop.f32.mrb[35].mxu1 }
 0x1e4   :  { %v2159_v55 = vadd.f32 %v2158_v41, %v2157_v20 }
 0x1e5   :  { %v1212_v51 = vpop.f32.mrb[4].mxu0  ;;  %v2632_v27 = vpop.f32.mrb[36].mxu1 }
 0x1e6   :  { %v2160_v54 = vmul.f32 %v1212_v51, %v1212_v51  ;;  %v1214_v7 = vpop.f32.mrb[5].mxu0  ;;  %v2132_v35 = vpop.f32.mrb[37].mxu1 }
 0x1e8   :  { %v2161_v44 = vadd.f32 %v2160_v54, %v2159_v55 }
 0x1e9   :  { %v1218_v56 = vpop.f32.mrb[6].mxu0  ;;  %v2635_v57 = vpop.f32.mrb[6].mxu1 }
 0x1ea   :  { %v2152_v52 = vmul.f32 %v1218_v56, %v1200_v43  ;;  %v1220_v10 = vpop.f32.mrb[7].mxu0  ;;  %v2142_v32 = vpop.f32.mrb[7].mxu1  ;;  %3120 = vrsqrt.f32 %v2161_v44  ;;  %v2169_v36 = vmul.f32 %v1218_v56, %v1218_v56  ;;  %vm2191_vm2 = vcmp.gt.f32.partialorder %v2635_v57, 1.0 }
 0x1eb   :  { %vm2186_vm0 = vcmp.gt.f32.partialorder %v2142_v32, 1.0  ;;  %v2192_v31 = vsel %vm2191_vm2, %v2635_v57, 0.0  ;;  %vm2164_vm4 = vcmp.eq.f32.partialorder %v2161_v44, inf  ;;  %v2167_v14 = vand.u32 2147483648, %v2161_v44 }
 0x1ec   :  { %v2187_v40 = vsel %vm2186_vm0, %v2142_v32, 0.0  ;;  %vm2166_vm5 = vcmp.eq.f32.partialorder %v2161_v44, 0.0 }
 0x1ed   :  { %v1224_v38 = vpop.f32.mrb[8].mxu0 }
 0x1ee   :  { %v2153_v16 = vmul.f32 %v1224_v38, %v1206_v2  ;;  %v2170_v37 = vmul.f32 %v1224_v38, %v1224_v38  ;;  %v1226_v15 = vpop.f32.mrb[9].mxu0 }
 0x1f0   :  { %v2154_v24 = vadd.f32 %v2153_v16, %v2152_v52  ;;  %v2171_v34 = vadd.f32 %v2170_v37, %v2169_v36 }
 0x1f1   :  { %v1230_v58 = vpop.f32.mrb[10].mxu0 }
 0x1f2   :  { %v2155_v53 = vmul.f32 %v1230_v58, %v1212_v51  ;;  %v2172_v9 = vmul.f32 %v1230_v58, %v1230_v58  ;;  %v1232_v29 = vpop.f32.mrb[11].mxu0 }
 0x1f4   :  { %v2156_v61 = vadd.f32 %v2155_v53, %v2154_v24  ;;  %v2173_v48 = vadd.f32 %v2172_v9, %v2171_v34  ;;  %v3121_v17 = vpop.eup %3120 }
 0x1f5   :  { %v1236_v59 = vpop.f32.mrb[12].mxu0  ;;  %v2163_v25 = vmul.f32 %v3121_v17, %v2161_v44 }
 0x1f6   :  { %3122 = vrsqrt.f32 %v2173_v48  ;;  %v1237_v1 = vpop.f32.mrb[13].mxu0  ;;  %vm2176_vm6 = vcmp.eq.f32.partialorder %v2173_v48, inf  ;;  %v2179_v63 = vand.u32 2147483648, %v2173_v48  ;;  %vm2178_vm7 = vcmp.eq.f32.partialorder %v2173_v48, 0.0 }
 0x1f7   :  { %vm2188_vm1 = vcmp.gt.f32.partialorder %v1237_v1, 1.0  ;;  %v2165_v60 = vsel %vm2164_vm4, %v2161_v44, %v2163_v25 }
 0x1f8   :  { %v2189_v26 = vsel %vm2188_vm1, %v1237_v1, 0.0  ;;  %v2168_v22 = vsel %vm2166_vm5, %v2167_v14, %v2165_v60 }
 0x1f9   :  { %v2190_v42 = vmin.f32 %v2187_v40, %v2189_v26  ;;  %v1242_v49 = vpop.f32.mrb[14].mxu0  ;;  %v2181_v12 = vadd.f32 1e-06, %v2168_v22 }
 0x1fa   :  { %v1243_v50 = vpop.f32.mrb[15].mxu0 }
 0x1fb   :  { %vm2193_vm3 = vcmp.gt.f32.partialorder %v1243_v50, 1.0 }
 0x1fc   :  { %v2194_v33 = vsel %vm2193_vm3, %v1243_v50, 0.0 }
 0x1fd   :  { %v2195_v8 = vmin.f32 %v2192_v31, %v2194_v33 }
 0x1ff   :  { %v2198_v19 = vmul.f32 %v2195_v8, %v2190_v42 }
 0x200   :  { %v3123_v46 = vpop.eup %3122 }
 0x201   :  { %v2175_v21 = vmul.f32 %v3123_v46, %v2173_v48 }
 0x203   :  { %v2177_v39 = vsel %vm2176_vm6, %v2173_v48, %v2175_v21 }
 0x204   :  { %v2180_v45 = vsel %vm2178_vm7, %v2179_v63, %v2177_v39 }
 0x205   :  { %v2182_v47 = vadd.f32 1e-06, %v2180_v45 }
 0x207   :  { %v2183_v28 = vmul.f32 %v2182_v47, %v2181_v12 }
 0x209   :  { %3124 = vrcp.f32 %v2183_v28 }
 0x213   :  { %v3125_v4 = vpop.eup %3124 }
 0x214   :  { %v2185_v5 = vmul.f32 %v3125_v4, %v2156_v61 }
 0x216   :  { %v2227_v11 = vadd.f32 -1.0, %v2185_v5 }
 0x218   :  { %v2197_v0 = vmul.f32 %v2227_v11, %v2227_v11 }
 0x21a   :  { %v2199_v23 = vmul.f32 %v2198_v19, %v2197_v0 }
 0x21c   :  { %2200 = vadd.xlane.f32.xlu0 %v2199_v23 }
 0x2a9   :  { %v2201_v43 = vpop.xlane.xlu0 %2200 }
 0x2aa   :  { %v2202_v62 = vrot.slane %v2201_v43, 4 }
 0x2ac   :  { %v2203_v13 = vadd.f32 %v2202_v62, %v2201_v43 }
 0x2ae   :  { %v2204_v18 = vrot.slane %v2203_v13, 2 }
 0x2b0   :  { %v2205_v2 = vadd.f32 %v2204_v18, %v2203_v13 }
 0x2b2   :  { %v2206_v3 = vrot.slane %v2205_v2, 1 }
 0x2b4   :  { %v2207_v20 = vadd.f32 %v2206_v3, %v2205_v2 }
 0x2b6   :  { %3110 = vpush %v2207_v20 }
 0x2e7   :  { %s3111_s1 = spop %3110 }
 0x2e8   :  { %s2209_s8 = smul.f32 0.033333335, %s3111_s1 }
 0x2ea   :  { %2211 = sst [smem:[#allocation7]] %s2209_s8 }
 0x2eb   :  { %3179 = shalt.err (!%p3176_p4)
}
 0x2ec   :  { %s3193_s16 = smov [#allocation7]  }
 0x2ed   :  { %2219 = dma.smem_to_hbm %s3193_s16, 16, %s4239_s2, [#allocation4]  }
 0x2ee   :  { %3184 = dma.done.wait [#allocation4], 16  }
 0x2ef   :  { %3185 = vsyncadd [#allocation4], 4294967280 }
 0x2f0   :  { %2223 = sfence }
 0x2f1   :  { %2224 = vsyncpa [#allocation3], 1 }
 0x2f2   :  { %2225 = vsyncpa [#allocation6], 1 }
 0x2f3   :  { %2226 = vsyncpa [#allocation4], 1 }

</bundles_post_ra>
